<compile_context>
chip_gen: v7x
topology: tpu7x:2x2x1
jax: 0.10.0
libtpu: 0.0.40
codegen_flags: <defaults>
</compile_context>

<pallas_src>
import functools

import jax
import jax.numpy as jnp
from jax.experimental import pallas as pl
from jax.experimental.pallas import tpu as pltpu


def _round_up(x, m):
    return ((x + m - 1) // m) * m


def _keep_mask(seed_u32, salt, shape, row_offset, keep_prob):
    """Deterministic per-element keep mask for inverted dropout.

    counter = global_row * ncols + col, mixed with a murmur3-style finalizer.
    Pure jnp -> identical results inside a Pallas kernel (Mosaic or interpret)
    and in plain JAX, which lets the test reproduce the training-mode output.
    """
    ncols = shape[-1]
    rows = jax.lax.broadcasted_iota(jnp.int32, shape, 0) + row_offset
    cols = jax.lax.broadcasted_iota(jnp.int32, shape, 1)
    h = (rows * ncols + cols).astype(jnp.uint32)
    h = h * jnp.uint32(0x9E3779B1) + seed_u32 + jnp.uint32((salt * 0x7F4A7C15) & 0xFFFFFFFF)
    h = h ^ (h >> 16)
    h = h * jnp.uint32(0x85EBCA6B)
    h = h ^ (h >> 13)
    h = h * jnp.uint32(0xC2B2AE35)
    h = h ^ (h >> 16)
    # keep iff top-16 hash bits < keep_prob * 2^16 (signed compare only)
    hi = (h >> 16).astype(jnp.int32)
    thresh = jnp.int32(int(round(keep_prob * 65536.0)))
    return hi < thresh


def _f_c_kernel(seed_ref,           # scalar-prefetch: (1,) int32
                x_ref,              # (TM, D)
                w1_ref, b1_ref,     # (D, H), (1, H)
                w2r_ref, b2_ref,    # (8, H) w2^T replicated on sublanes, (1, 1)
                out_ref,            # (1, TM)  lane-dense output row
                *, training: bool, keep_prob: float, tile_m: int):
    x = x_ref[...].astype(jnp.float32)

    if training:
        seed_u32 = seed_ref[0].astype(jnp.uint32)
        row0 = pl.program_id(0) * tile_m
        inv_keep = 1.0 / keep_prob
        keep0 = _keep_mask(seed_u32, 0, x.shape, row0, keep_prob)
        x = jnp.where(keep0, x, 0.0) * inv_keep

    # fc1: [TM, D] @ [D, H] + b1 -> relu
    h = jnp.dot(x, w1_ref[...], preferred_element_type=jnp.float32) + b1_ref[...]
    h = jnp.maximum(h, 0.0)

    if training:
        keep1 = _keep_mask(seed_u32, 1, h.shape, row0, keep_prob)
        h = jnp.where(keep1, h, 0.0) * inv_keep

    # fc2 computed transposed (w2^T rows replicated to 8 sublanes, a @ b.T form)
    # so the per-tile result is [1, TM]: TM lanes (multiple of 128) => unmasked,
    # lane-dense stores instead of 1-lane masked stores.
    zt = jax.lax.dot_general(
        w2r_ref[...], h,
        dimension_numbers=(((1,), (1,)), ((), ())),
        preferred_element_type=jnp.float32)           # (8, TM), all rows identical
    z = zt[0:1, :] + b2_ref[...]                      # (1, TM)
    out_ref[...] = (1.0 / (1.0 + jnp.exp(-z))).astype(out_ref.dtype)


def f_c_forward(x, w1, b1, w2, b2, *, seed=0, training=True,
                dropout_p=0.5, tile_m=256):
    """x: [N, D] -> [N, 1].  w1: [D, H], b1: [H], w2: [H, 1], b2: [1]."""
    N, in_dim = x.shape
    hid_dim = w1.shape[1]
    assert w1.shape == (in_dim, hid_dim)
    assert w2.shape == (hid_dim, 1)
    keep_prob = 1.0 - dropout_p

    # Row-tile size: large (amortize per-step pipeline overhead), multiple of 8,
    # never larger than the (rounded) batch.
    tile_m = _round_up(max(8, min(tile_m, _round_up(N, 8))), 8)
    n_pad = _round_up(N, tile_m)
    if n_pad != N:
        x = jnp.pad(x, ((0, n_pad - N), (0, 0)))
    grid = (n_pad // tile_m,)

    seed_arr = jnp.array([seed], dtype=jnp.int32)
    b1_2d = b1.reshape(1, hid_dim)
    w2_rep = jnp.tile(w2.reshape(1, hid_dim), (8, 1))   # (8, H): MXU-friendly lhs
    b2_2d = b2.reshape(1, 1)

    kernel = functools.partial(_f_c_kernel, training=training,
                               keep_prob=keep_prob, tile_m=tile_m)

    # VMEM budget: double-buffered x/out tiles + resident weights + slack for the
    # f32 intermediates ([TM, D] dropout temp, [TM, H] hidden).
    tile_bytes = 4 * (2 * tile_m * in_dim            # x (double buffered)
                      + 2 * tile_m                   # out row (double buffered)
                      + 2 * (in_dim * hid_dim + 9 * hid_dim + 1)  # weights/biases
                      + 2 * tile_m * (in_dim + hid_dim))          # intermediates
    vmem_limit = int(min(max(2 * tile_bytes, 16 * 1024 * 1024), 48 * 1024 * 1024))

    grid_spec = pltpu.PrefetchScalarGridSpec(
        num_scalar_prefetch=1,
        grid=grid,
        in_specs=[
            pl.BlockSpec((tile_m, in_dim), lambda i, seed: (i, 0)),    # x tile
            pl.BlockSpec((in_dim, hid_dim), lambda i, seed: (0, 0)),   # w1 (resident)
            pl.BlockSpec((1, hid_dim), lambda i, seed: (0, 0)),        # b1
            pl.BlockSpec((8, hid_dim), lambda i, seed: (0, 0)),        # w2^T replicated
            pl.BlockSpec((1, 1), lambda i, seed: (0, 0)),              # b2
        ],
        # Lane-dense output: one (1, tile_m) row per grid step.
        out_specs=pl.BlockSpec((1, tile_m), lambda i, seed: (0, i)),
    )

    out_row = pl.pallas_call(
        kernel,
        out_shape=jax.ShapeDtypeStruct((1, n_pad), x.dtype),
        grid_spec=grid_spec,
        compiler_params=pltpu.CompilerParams(
            dimension_semantics=("parallel",),   # tiles independent (hash RNG, disjoint out)
            vmem_limit_bytes=vmem_limit),
    )(seed_arr, x, w1, b1_2d, w2_rep, b2_2d)

    # (1, n_pad) -> (N, 1); the HBM reshape/slice is free (contiguous).
    return out_row.reshape(-1)[:N].reshape(N, 1)


def init_params(key, input_shape):
    """nn.Linear-style init (uniform +/- 1/sqrt(fan_in)); weights stored [in, out]."""
    in_dim = input_shape
    hid_dim = input_shape // 2
    k1, k2, k3, k4 = jax.random.split(key, 4)
    lim1 = 1.0 / float(jnp.sqrt(jnp.float32(in_dim)))
    lim2 = 1.0 / float(jnp.sqrt(jnp.float32(hid_dim)))
    w1 = jax.random.uniform(k1, (in_dim, hid_dim), jnp.float32, -lim1, lim1)
    b1 = jax.random.uniform(k2, (hid_dim,), jnp.float32, -lim1, lim1)
    w2 = jax.random.uniform(k3, (hid_dim, 1), jnp.float32, -lim2, lim2)
    b2 = jax.random.uniform(k4, (1,), jnp.float32, -lim2, lim2)
    return w1, b1, w2, b2


if __name__ == "__main__":
    # Keep the pure-JAX reference matmuls in true f32 so the check is tight.
    jax.config.update("jax_default_matmul_precision", "highest")

    input_shape = 128      # F_c_module_(input_shape): fc1 128->64, fc2 64->1
    N = 300                # number of edge rows (not a tile multiple -> exercises padding)

    key = jax.random.PRNGKey(0)
    kp, kx = jax.random.split(key)
    w1, b1, w2, b2 = init_params(kp, input_shape)
    x = jax.random.normal(kx, (N, input_shape), dtype=jnp.float32)

    # --- eval mode (dropout = identity): cross-check against pure JAX ---
    out_eval = f_c_forward(x, w1, b1, w2, b2, training=False)
    out_eval = jax.block_until_ready(out_eval)
    ref_eval = 1.0 / (1.0 + jnp.exp(-(jnp.maximum(x @ w1 + b1, 0.0) @ w2 + b2)))
    assert out_eval.shape == (N, 1)
    assert jnp.allclose(out_eval, ref_eval, atol=1e-4, rtol=1e-4), float(
        jnp.max(jnp.abs(out_eval - ref_eval)))

    # --- training mode (F.dropout defaults: p=0.5, training=True) ---
    seed = 0
    out_train = f_c_forward(x, w1, b1, w2, b2, seed=seed, training=True)
    out_train = jax.block_until_ready(out_train)
    # Pure-JAX reference using the same hash-derived masks.
    s = jnp.uint32(seed)
    x_d = jnp.where(_keep_mask(s, 0, x.shape, 0, 0.5), x, 0.0) * 2.0
    h_r = jnp.maximum(x_d @ w1 + b1, 0.0)
    h_d = jnp.where(_keep_mask(s, 1, h_r.shape, 0, 0.5), h_r, 0.0) * 2.0
    ref_train = 1.0 / (1.0 + jnp.exp(-(h_d @ w2 + b2)))
    assert out_train.shape == (N, 1)
    assert bool(jnp.isfinite(out_train).all())
    assert jnp.allclose(out_train, ref_train, atol=1e-4, rtol=1e-4), float(
        jnp.max(jnp.abs(out_train - ref_train)))

    print("KERNEL_OK")
</pallas_src>

<mosaic_0001>
module attributes {stable_mosaic.version = 11 : i64} {
  func.func @_f_c_kernel(%arg0: i32, %arg1: memref<1xi32, #tpu.memory_space<smem>>, %arg2: memref<256x128xf32, #tpu.memory_space<vmem>>, %arg3: memref<128x64xf32, #tpu.memory_space<vmem>>, %arg4: memref<1x64xf32, #tpu.memory_space<vmem>>, %arg5: memref<8x64xf32, #tpu.memory_space<vmem>>, %arg6: memref<1x1xf32, #tpu.memory_space<vmem>>, %arg7: memref<1x256xf32, #tpu.memory_space<vmem>>) attributes {dimension_semantics = [#tpu.dimension_semantics<parallel>], iteration_bounds = array<i64: 2>, scalar_prefetch = 1 : i64, scratch_operands = 0 : i64, tpu.core_type = #tpu.core_type<tc>, window_params = [{transform_indices = @transform_0, window_bounds = array<i64: 256, 128>}, {pipeline_mode = #tpu.pipeline_mode<synchronous>, transform_indices = @transform_1, window_bounds = array<i64: 128, 64>}, {pipeline_mode = #tpu.pipeline_mode<synchronous>, transform_indices = @transform_2, window_bounds = array<i64: 1, 64>}, {pipeline_mode = #tpu.pipeline_mode<synchronous>, transform_indices = @transform_3, window_bounds = array<i64: 8, 64>}, {pipeline_mode = #tpu.pipeline_mode<synchronous>, transform_indices = @transform_4, window_bounds = array<i64: 1, 1>}, {transform_indices = @transform_5, window_bounds = array<i64: 1, 256>}]} {
    %c0 = arith.constant 0 : index
    %c0_0 = arith.constant 0 : index
    %0 = vector.load %arg2[%c0, %c0_0] : memref<256x128xf32, #tpu.memory_space<vmem>>, vector<256x128xf32>
    %c0_1 = arith.constant 0 : index
    %c0_2 = arith.constant 0 : index
    %1 = vector.load %arg3[%c0_1, %c0_2] : memref<128x64xf32, #tpu.memory_space<vmem>>, vector<128x64xf32>
    %cst = arith.constant dense<0.000000e+00> : vector<256x64xf32>
    %2 = tpu.matmul %0, %1, %cst {dimension_numbers = #tpu.dot_dimension_numbers<[1], [0], [0], [1], [0, 0, 1, 1], [], []>, precision = #tpu.contract_precision<fp32>} : vector<256x128xf32>, vector<128x64xf32>, vector<256x64xf32> -> vector<256x64xf32>
    %c0_3 = arith.constant 0 : index
    %c0_4 = arith.constant 0 : index
    %3 = vector.load %arg4[%c0_3, %c0_4] : memref<1x64xf32, #tpu.memory_space<vmem>>, vector<1x64xf32>
    %4 = vector.broadcast %3 : vector<1x64xf32> to vector<256x64xf32>
    %5 = arith.addf %2, %4 : vector<256x64xf32>
    %cst_5 = arith.constant 0.000000e+00 : f32
    %6 = vector.broadcast %cst_5 : f32 to vector<256x64xf32>
    %7 = arith.maximumf %5, %6 : vector<256x64xf32>
    %c0_6 = arith.constant 0 : index
    %c0_7 = arith.constant 0 : index
    %8 = vector.load %arg5[%c0_6, %c0_7] : memref<8x64xf32, #tpu.memory_space<vmem>>, vector<8x64xf32>
    %cst_8 = arith.constant dense<0.000000e+00> : vector<8x256xf32>
    %9 = tpu.matmul %8, %7, %cst_8 {dimension_numbers = #tpu.dot_dimension_numbers<[1], [1], [0], [0], [0, 0, 1, 0], [], []>, precision = #tpu.contract_precision<fp32>} : vector<8x64xf32>, vector<256x64xf32>, vector<8x256xf32> -> vector<8x256xf32>
    %10 = vector.extract_strided_slice %9 {offsets = [0, 0], sizes = [1, 256], strides = [1, 1]} : vector<8x256xf32> to vector<1x256xf32>
    %c0_9 = arith.constant 0 : index
    %c0_10 = arith.constant 0 : index
    %11 = vector.load %arg6[%c0_9, %c0_10] : memref<1x1xf32, #tpu.memory_space<vmem>>, vector<1x1xf32>
    %12 = vector.broadcast %11 : vector<1x1xf32> to vector<1x256xf32>
    %13 = arith.addf %10, %12 : vector<1x256xf32>
    %cst_11 = arith.constant 0.000000e+00 : f32
    %14 = vector.broadcast %cst_11 : f32 to vector<1x256xf32>
    %15 = arith.subf %14, %13 : vector<1x256xf32>
    %16 = math.exp %15 : vector<1x256xf32>
    %cst_12 = arith.constant 1.000000e+00 : f32
    %17 = vector.broadcast %cst_12 : f32 to vector<1x256xf32>
    %18 = arith.addf %17, %16 : vector<1x256xf32>
    %cst_13 = arith.constant 1.000000e+00 : f32
    %19 = vector.broadcast %cst_13 : f32 to vector<1x256xf32>
    %20 = arith.divf %19, %18 : vector<1x256xf32>
    %c0_14 = arith.constant 0 : index
    %c0_15 = arith.constant 0 : index
    %21 = vector.load %arg7[%c0_14, %c0_15] : memref<1x256xf32, #tpu.memory_space<vmem>>, vector<1x256xf32>
    tpu.vector_store %arg7[%c0_14, %c0_15], %20 {strides = array<i32>} : memref<1x256xf32, #tpu.memory_space<vmem>>, vector<1x256xf32>,
    return
  }
  func.func @transform_0(%arg0: i32, %arg1: memref<1xi32, #tpu.memory_space<smem>>) -> (i32, i32) {
    %c0_i32 = arith.constant 0 : i32
    %c0_i32_0 = arith.constant 0 : i32
    return %arg0, %c0_i32 : i32, i32
  }
  func.func @transform_1(%arg0: i32, %arg1: memref<1xi32, #tpu.memory_space<smem>>) -> (i32, i32) {
    %c0_i32 = arith.constant 0 : i32
    %c0_i32_0 = arith.constant 0 : i32
    %c0_i32_1 = arith.constant 0 : i32
    return %c0_i32, %c0_i32_0 : i32, i32
  }
  func.func @transform_2(%arg0: i32, %arg1: memref<1xi32, #tpu.memory_space<smem>>) -> (i32, i32) {
    %c0_i32 = arith.constant 0 : i32
    %c0_i32_0 = arith.constant 0 : i32
    %c0_i32_1 = arith.constant 0 : i32
    return %c0_i32, %c0_i32_0 : i32, i32
  }
  func.func @transform_3(%arg0: i32, %arg1: memref<1xi32, #tpu.memory_space<smem>>) -> (i32, i32) {
    %c0_i32 = arith.constant 0 : i32
    %c0_i32_0 = arith.constant 0 : i32
    %c0_i32_1 = arith.constant 0 : i32
    return %c0_i32, %c0_i32_0 : i32, i32
  }
  func.func @transform_4(%arg0: i32, %arg1: memref<1xi32, #tpu.memory_space<smem>>) -> (i32, i32) {
    %c0_i32 = arith.constant 0 : i32
    %c0_i32_0 = arith.constant 0 : i32
    %c0_i32_1 = arith.constant 0 : i32
    return %c0_i32, %c0_i32_0 : i32, i32
  }
  func.func @transform_5(%arg0: i32, %arg1: memref<1xi32, #tpu.memory_space<smem>>) -> (i32, i32) {
    %c0_i32 = arith.constant 0 : i32
    %c0_i32_0 = arith.constant 0 : i32
    return %c0_i32, %arg0 : i32, i32
  }
}

</mosaic_0001>

<bundles_post_ra>
// kernel: tpu_custom_call.1
= control target key start
LH: loop header
LB: loop body
LE: loop exit
PB: predicated region body
PF: predicated region fallthrough
CT: control target
= control target key end

     0   :  { %s6882_s0 = inlined_call_operand.<no memory space> [shape: s32[1], index: 0, kind: input, shape index: {}]   ;;  %s6883_s1 = inlined_call_operand.hbm [shape: f32[512,128], index: 1, kind: input, shape index: {}]   ;;  %s6884_s2 = inlined_call_operand.vmem [shape: f32[128,64], index: 2, kind: input, shape index: {}]   ;;  %s6885_s3 = inlined_call_operand.vmem [shape: f32[1,64], index: 3, kind: input, shape index: {}]   ;;  %s6886_s4 = inlined_call_operand.vmem [shape: f32[8,64], index: 4, kind: input, shape index: {}]   ;;  %s6887_s5 = inlined_call_operand.<no memory space> [shape: f32[1,1], index: 5, kind: input, shape index: {}]   ;;  %s6888_s6 = inlined_call_operand.hbm [shape: f32[1,512], index: 6, kind: output, shape index: {}]  }
   0x1   :  { %v12_v0 = vstv %s6887_s5 }
   0x2   :  { %13 = vst [vmem:[#allocation4] sm:$0x1] %v12_v0 }
   0x3   :  { %14 = vsyncpa [#allocation6], 0 }
   0x4   :  { %16 = vsyncpa [#allocation6 + $0x1], 0 }
   0x5   :  { %17 = vsyncpa [#allocation7], 0 }
   0x6   :  { %19 = vsyncpa [#allocation7 + $0x1], 0  ;;  %s5174_s22 = smov 0   ;;  %s5176_s23 = smov 0  }
   0x7   :  { %s5178_s24 = smov 0   ;;  %s5180_s25 = smov 0  }
   0x8 LB: > { %s5195_s5 = sadd.s32 4294967295, %s5128_s25   ;;  %s3398_s26 = sadd.s32 4294967294, %s5128_s25   ;;  %s5128_s25 = sphi %s5180_s25, %s7435_s25   ;;  %s5124_s24 = sphi %s5178_s24, %s7434_s24   ;;  %s5120_s23 = sphi %s5176_s23, %s7433_s23   ;;  %s5116_s22 = sphi %s5174_s22, %s7432_s22  }
   0x9   : > { %s5199_s27 = sadd.s32 1, %s5128_s25   ;;  %s32_s28 = sadd.s32 1, %s5124_s24 }
   0xa   : > { %s29_s29 = ssub.s32 %s5128_s25, %s5199_s27  ;;  %p39_p0 = scmp.ne.s32.totalorder %s5124_s24, %s5120_s23 }
   0xb   : > { %p30_p1 = scmp.eq.s32.totalorder %s29_s29, 0  ;;  %p40_p2 = scmp.eq.s32.totalorder %s5128_s25, 0 }
   0xc   : > { %p45_p3 = scmp.ne.s32.totalorder %s5120_s23, %s5116_s22  ;;  %p46_p4 = scmp.eq.s32.totalorder %s5195_s5, 0 }
   0xd   : > { %s5211_s30 = scalar_select %p30_p1, %s5124_s24, %s32_s28  }
   0xe   : > { %p5213_p5 = por %p40_p2, %p39_p0  ;;  %p5217_p6 = por %p46_p4, %p45_p3 }
   0xf   : > { %p153_p7 = scmp.eq.s32.totalorder %s5195_s5, 1  ;;  %p159_p8 = scmp.eq.s32.totalorder %s3398_s26, 1 }
  0x10   : > { %p4985_p10 = scmp.lt.s32.totalorder %s5128_s25, 2  ;;  %s191_s11 = sand.u32 1, %s5124_s24  }
  0x11   : > { %p5224_p11 = por %p153_p7, %p39_p0  ;;  %p5228_p12 = por %p159_p8, %p45_p3 }
  0x12   : > { %s3413_s12 = sshll.u32 %s5128_s25, 12  ;;  %s3401_s13 = sshll.u32 %s191_s11, 8 }
  0x13   : > { %s7105_s9 = scalar_select %p5224_p11, 1, 0 }
  0x14   : > { %s7106_s10 = scalar_select %p5228_p12, 1, 0 }
  0x15   : > { %s5237_s16 = scalar_lea.hbm %s6883_s1, %s3413_s12  ;;  %s195_s17 = scalar_lea.vmem [#allocation5], %s3401_s13 }
  0x16   : > { %s202_s18 = sshll.u32 %s195_s17, 4  ;;  %p5241_p13 = pnand %p4985_p10, %p5213_p5  ;;  %s5245_s18 = int_to_ptr.vmem [resolvable:$true] %s202_s18 }
  0x17   : > { %s5247_s20 = scalar_lea.sflag [#allocation6], %s191_s11  ;;  %s5032_s21 = scalar_lea.hbm %s5237_s16, 4096 }
  0x18   : > { %p5033_p0 = scmp.ne.s32.totalorder %s5237_s16, %s5032_s21  ;;  %p5034_p1 = pneg %p5241_p13 }
  0x19   : > { %s5037_s28 = scalar_lea.hbm %s6883_s1, 8192  ;;  %p5038_p4 = scmp.lt.u32.totalorder %s5237_s16, %s6883_s1 }
  0x1a   : > { %p5035_p2 = pnand %p5034_p1, %p5033_p0  ;;  %p5039_p5 = scmp.lt.u32.totalorder %s5037_s28, %s5032_s21 }
  0x1b   : > { %p5041_p8 = scmp.lt.u32.totalorder %s5032_s21, %s5237_s16 }
  0x1c   : > { %p5036_p3 = pneg %p5035_p2  ;;  %p5040_p7 = por %p5039_p5, %p5038_p4 }
  0x1e   : > { %p5042_p10 = por %p5041_p8, %p5040_p7 }
  0x20   : > { %p5043_p9 = pnand %p5042_p10, %p5036_p3 }
  0x22   : > { %5046 = shalt.err (!%p5043_p9)
}
  0x23   : > { %s5047_s11 = scalar_lea.vmem %s5245_s18, 4096  ;;  %s5130_s12 = smov [#allocation5]  }
  0x24   : > { %p5048_p0 = scmp.ne.s32.totalorder %s5245_s18, %s5047_s11  ;;  %s5052_s13 = sshll.u32 %s5130_s12, 4  ;;  %s5053_s13 = int_to_ptr.vmem [resolvable:$false] %s5052_s13 }
  0x25   : > { %s5054_s14 = scalar_lea.vmem %s5053_s13, 8192  ;;  %p5055_p11 = scmp.lt.s32.totalorder %s5245_s18, %s5053_s13 }
  0x26   : > { %p5050_p2 = pnand %p5048_p0, %p5034_p1  ;;  %p5056_p4 = scmp.lt.s32.totalorder %s5054_s14, %s5047_s11 }
  0x28   : > { %p5051_p12 = pneg %p5050_p2  ;;  %p5057_p5 = por %p5056_p4, %p5055_p11 }
  0x2a   : > { %p5058_p7 = pnand %p5057_p5, %p5051_p12 }
  0x2c   : > { %5061 = shalt.err (!%p5058_p7)
}
  0x2d   : > { %s5131_s15 = smov 128   ;;  %s5132_s17 = smov 8  }
  0x2e   : > { %4980 = dma.hbm_to_vmem [thread:$0]  (!%p5241_p13), %s5237_s16, 4096, %s5245_s18, %s5247_s20, %s5131_s15, %s5131_s15, %s5132_s17  }
  0x2f   : > { %p3404_p9 = scmp.ge.s32.totalorder %s5128_s25, 1  ;;  %p210_p1 = scmp.lt.s32.totalorder %s5128_s25, 3 }
  0x31   : > { %p211_p3 = pnand %p3404_p9, %p210_p1 }
  0x33   : > { %214 = sbr.rel (%p211_p3) target bundleno = 1329 (0x531), region = 40 }
  0x3a   : > { %s5278_s21 = sand.u32 1, %s5120_s23  }
  0x3b   : > { %s3405_s0 = sshll.u32 %s5278_s21, 8  ;;  %s217_s26 = scalar_lea.sflag [#allocation6], %s5278_s21 }
  0x3c   : > { %s5282_s28 = scalar_lea.vmem [#allocation5], %s3405_s0 }
  0x3d   : > { %5107 = dma.done.wait (%p5217_p6), %s217_s26, 4096  }
  0x3e   : > { %5109 = vsyncadd (%p5217_p6), %s217_s26, 4294963200  ;;  %v281_v1 = vld [vmem:[%s6884_s2] sm:$0xff]  ;;  %v282_v2 = vld [vmem:[%s6884_s2 + $0x8] sm:$0xff]  ;;  %vm2311_vm0 = vcmask 523264   ;;  %s3406_s7 = sshll.u32 %s5278_s21, 1  ;;  %s3414_s11 = sshll.u32 %s5195_s5, 5 }
  0x3f   : > { %v283_v3 = vld [vmem:[%s6884_s2 + $0x10] sm:$0xff]  ;;  %v305_v4 = vand.u32 4294901760, %v281_v1  ;;  %v308_v5 = vand.u32 4294901760, %v282_v2  ;;  %v284_v6 = vld [vmem:[%s6884_s2 + $0x18] sm:$0xff]  ;;  %v5303_v8 = vld [vmem:[%s6884_s2 + $0x20] sm:$0xff]  ;;  %s246_s12 = scalar_lea.vmem [#allocation8], %s3406_s7  ;;  %s6838_s15 = scalar_lea.hbm %s6888_s6, %s3414_s11 }
  0x40   : > { %v311_v7 = vand.u32 4294901760, %v283_v3  ;;  %v5308_v9 = vld [vmem:[%s6884_s2 + $0x28] sm:$0xff]  ;;  %v314_v10 = vand.u32 4294901760, %v284_v6  ;;  %v317_v12 = vand.u32 4294901760, %v5303_v8  ;;  %v5319_v15 = vld [vmem:[%s6884_s2 + $0x30] sm:$0xff]  ;;  %v5324_v16 = vld [vmem:[%s6884_s2 + $0x38] sm:$0xff] }
  0x41   : > { %v5310_v11 = vpack.c.bf16 %v308_v5, %v305_v4  ;;  %v320_v13 = vand.u32 4294901760, %v5308_v9  ;;  %v249_v17 = vld [vmem:[%s5282_s28] sm:$0xff]  ;;  %v323_v20 = vand.u32 4294901760, %v5319_v15  ;;  %v326_v21 = vand.u32 4294901760, %v5324_v16  ;;  %v250_v26 = vld [vmem:[%s5282_s28 + $0x8] sm:$0xff]  ;;  %v5373_v31 = vld [vmem:[%s6884_s2 + $0x58] sm:$0xff] }
  0x42   : > { %v5314_v14 = vpack.c.bf16 %v314_v10, %v311_v7  ;;  %v5329_v18 = vand.u32 4294901760, %v249_v17  ;;  %v5343_v22 = vld [vmem:[%s6884_s2 + $0x40] sm:$0xff]  ;;  %v5348_v23 = vld [vmem:[%s6884_s2 + $0x48] sm:$0xff]  ;;  %v5368_v30 = vld [vmem:[%s6884_s2 + $0x50] sm:$0xff]  ;;  %v5379_v34 = vand.u32 4294901760, %v250_v26  ;;  %v5393_v39 = vsub.f32 %v281_v1, %v305_v4  ;;  %s3328_s8 = sshll.u32 %s246_s12, 4  ;;  %s6840_s8 = int_to_ptr.vmem [resolvable:$true] %s3328_s8 }
  0x43   : > { %4388 = vmatprep.subr.bf16.mxu0 %v5310_v11  ;;  %v5336_v19 = vpack.c.bf16 %v320_v13, %v317_v12  ;;  %v5361_v27 = vpack.c.bf16 %v326_v21, %v323_v20  ;;  %v6906_v28 = vand.u32 4294901760, %v5343_v22  ;;  %v6904_v29 = vand.u32 4294901760, %v5348_v23  ;;  %v251_v33 = vld [vmem:[%s5282_s28 + $0x10] sm:$0xff]  ;;  %v252_v35 = vld [vmem:[%s5282_s28 + $0x18] sm:$0xff]  ;;  %v5391_v37 = vld [vmem:[%s6884_s2 + $0x68] sm:$0xff]  ;;  %s3314_s17 = scalar_lea.sflag [#allocation7], %s5278_s21 }
  0x44   : > { %7108 = vst [vmem:[#allocation11_spill] sm:$0xff] %v5314_v14  ;;  %4390 = vmatpush3.bf16.msra.mxu0 %v5310_v11  ;;  %v5351_v24 = vsub.f32 %v249_v17, %v5329_v18  ;;  %v5386_v36 = vld [vmem:[%s6884_s2 + $0x60] sm:$0xff]  ;;  %v5395_v40 = vsub.f32 %v282_v2, %v308_v5  ;;  %v6903_v43 = vand.u32 4294901760, %v5368_v30  ;;  %v6901_v44 = vand.u32 4294901760, %v5373_v31  ;;  %v254_v47 = vld [vmem:[%s5282_s28 + $0x28] sm:$0xff]  ;;  %v5422_v51 = vld [vmem:[%s6884_s2 + $0x78] sm:$0xff] }
  0x45   : > { %4392 = vmatprep.subr.bf16.mxu0 %v5314_v14  ;;  %7109 = vst [vmem:[#allocation12_spill] sm:$0xff] %v5336_v19  ;;  %7111 = vst [vmem:[#allocation14_spill] sm:$0xff] %v5361_v27  ;;  %v253_v41 = vld [vmem:[%s5282_s28 + $0x20] sm:$0xff]  ;;  %v5403_v42 = vpack.c.bf16 %v6904_v29, %v6906_v28  ;;  %v5407_v45 = vand.u32 4294901760, %v251_v33  ;;  %v5409_v46 = vand.u32 4294901760, %v252_v35  ;;  %v6899_v48 = vand.u32 4294901760, %v5386_v36 }
  0x46   : > { %7110 = vst [vmem:[#allocation13_spill] sm:$0xff] %v5351_v24  ;;  %v6890_v25 = vand.u32 4294901760, %v5351_v24  ;;  %v6896_v49 = vand.u32 4294901760, %v5391_v37  ;;  %v5417_v50 = vld [vmem:[%s6884_s2 + $0x70] sm:$0xff]  ;;  %v5425_v52 = vsub.f32 %v250_v26, %v5379_v34  ;;  %v5427_v53 = vand.u32 4294901760, %v253_v41  ;;  %v260_v28 = vld [vmem:[%s5282_s28 + $0x58] sm:$0xff] }
  0x47   : > { %7112 = vst [vmem:[#allocation15_spill] sm:$0xff] %v5403_v42  ;;  %v6893_v54 = vand.u32 4294901760, %v5393_v39  ;;  %v6891_v55 = vand.u32 4294901760, %v5395_v40  ;;  %v5432_v56 = vsub.f32 %v283_v3, %v311_v7  ;;  %v5434_v57 = vsub.f32 %v284_v6, %v314_v10  ;;  %v255_v7 = vld [vmem:[%s5282_s28 + $0x30] sm:$0xff]  ;;  %v256_v10 = vld [vmem:[%s5282_s28 + $0x38] sm:$0xff]  ;;  %s5062_s0 = scalar_lea.vmem %s6840_s8, 32 }
  0x48   : > { %4394 = vmatpush3.bf16.msra.mxu0 %v5314_v14  ;;  %v388_v32 = vsub.f32 %v5351_v24, %v6890_v25  ;;  %7113 = vst [vmem:[#allocation16_spill] sm:$0xff] %v5425_v52  ;;  %v5441_v58 = vpack.c.bf16 %v6901_v44, %v6903_v43  ;;  %v5444_v59 = vsub.f32 %v251_v33, %v5407_v45  ;;  %v5446_v60 = vand.u32 4294901760, %v254_v47  ;;  %p5063_p6 = scmp.ne.s32.totalorder %s6840_s8, %s5062_s0  ;;  %p7429_p11 = scmp.ne.s32.totalorder %s7105_s9, 0 }
  0x49   : > { %4396 = vmatprep.subr.bf16.mxu0 %v5336_v19  ;;  %7114 = vst [vmem:[#allocation17_spill] sm:$0xff] %v5432_v56  ;;  %7115 = vst [vmem:[#allocation18_spill] sm:$0xff] %v5434_v57  ;;  %v6895_v61 = vand.u32 4294901760, %v5417_v50  ;;  %v6894_v62 = vand.u32 4294901760, %v5422_v51  ;;  %v5451_v63 = vsub.f32 %v252_v35, %v5409_v46  ;;  %v5457_v0 = vpack.c.bf16 %v6896_v49, %v6899_v48  ;;  %v259_v49 = vld [vmem:[%s5282_s28 + $0x50] sm:$0xff]  ;;  %s5135_s5 = smov [#allocation8]  }
  0x4a   : > { %v389_v38 = vand.u32 4294901760, %v388_v32  ;;  %7116 = vst [vmem:[#allocation19_spill] sm:$0xff] %v5441_v58  ;;  %7117 = vst [vmem:[#allocation20_spill] sm:$0xff] %v5444_v59  ;;  %v6892_v1 = vand.u32 4294901760, %v5425_v52  ;;  %v5461_v2 = vsub.f32 %v253_v41, %v5427_v53  ;;  %v709_v3 = vsub.f32 %v5393_v39, %v6893_v54  ;;  %v258_v54 = vld [vmem:[%s5282_s28 + $0x48] sm:$0xff]  ;;  %p5064_p12 = pnand %p5063_p6, %p7429_p11  ;;  %s5066_s26 = sshll.u32 %s5135_s5, 4  ;;  %s5067_s26 = int_to_ptr.vmem [resolvable:$false] %s5066_s26 }
  0x4b   : > { %7118 = vst [vmem:[#allocation21_spill] sm:$0xff] %v5451_v63  ;;  %7119 = vst [vmem:[#allocation22_spill] sm:$0xff] %v5457_v0  ;;  %v716_v4 = vsub.f32 %v5395_v40, %v6891_v55  ;;  %v6897_v5 = vand.u32 4294901760, %v5432_v56  ;;  %v6898_v6 = vand.u32 4294901760, %v5434_v57  ;;  %v6900_v17 = vand.u32 4294901760, %v5444_v59  ;;  %s5068_s16 = scalar_lea.vmem %s5067_s26, 64  ;;  %p5069_p8 = scmp.lt.s32.totalorder %s6840_s8, %s5067_s26 }
  0x4c   : > { %4398 = vmatpush3.bf16.msra.mxu0 %v5336_v19  ;;  %3939 = vmatprep.mubr.f32.mxu0 %v389_v38  ;;  %7120 = vst [vmem:[#allocation23_spill] sm:$0xff] %v5461_v2  ;;  %v5477_v26 = vsub.f32 %v254_v47, %v5446_v60  ;;  %v5482_v32 = vsub.f32 %v5303_v8, %v317_v12  ;;  %v6902_v38 = vand.u32 4294901760, %v5451_v63  ;;  %v6905_v8 = vand.u32 4294901760, %v5461_v2  ;;  %p5065_p13 = pneg %p5064_p12  ;;  %p5070_p10 = scmp.lt.s32.totalorder %s5068_s16, %s5062_s0 }
  0x4d   : > { %4400 = vmatprep.subr.bf16.mxu0 %v5361_v27  ;;  %v5487_v33 = vsub.f32 %v5308_v9, %v320_v13  ;;  %v5493_v35 = vpack.c.bf16 %v6894_v62, %v6895_v61  ;;  %v398_v41 = vsub.f32 %v5425_v52, %v6892_v1  ;;  %v5500_v12 = vand.u32 4294901760, %v255_v7  ;;  %v257_v9 = vld [vmem:[%s5282_s28 + $0x40] sm:$0xff] }
  0x4e   : > { %7121 = vst [vmem:[#allocation24_spill] sm:$0xff] %v5477_v26  ;;  %7122 = vst [vmem:[#allocation25_spill] sm:$0xff] %v5482_v32  ;;  %v5502_v47 = vand.u32 4294901760, %v256_v10  ;;  %v710_v13 = vand.u32 4294901760, %v709_v3  ;;  %v717_v25 = vand.u32 4294901760, %v716_v4  ;;  %v723_v55 = vsub.f32 %v5432_v56, %v6897_v5  ;;  %p5071_p0 = por %p5070_p10, %p5069_p8 }
  0x4f   : > { %7123 = vst [vmem:[#allocation26_spill] sm:$0xff] %v5487_v33  ;;  %7124 = vst [vmem:[#allocation27_spill] sm:$0xff] %v5493_v35  ;;  %v730_v1 = vsub.f32 %v5434_v57, %v6898_v6  ;;  %v408_v62 = vsub.f32 %v5444_v59, %v6900_v17  ;;  %v6909_v61 = vand.u32 4294901760, %v5477_v26  ;;  %v6907_v3 = vand.u32 4294901760, %v5482_v32  ;;  %v268_v59 = vld [vmem:[%s5282_s28 + $0x98] sm:$0xff] }
  0x50   : > { %4402 = vmatpush3.bf16.msra.mxu0 %v5361_v27  ;;  %v6908_v4 = vand.u32 4294901760, %v5487_v33  ;;  %v5524_v5 = vsub.f32 %v5451_v63, %v6902_v38  ;;  %v5526_v6 = vand.u32 4294901760, %v257_v9  ;;  %v5531_v48 = vsub.f32 %v5319_v15, %v323_v20  ;;  %p5072_p2 = pnand %p5071_p0, %p5065_p13 }
  0x51   : > { %4404 = vmatprep.subr.bf16.mxu0 %v5403_v42  ;;  %v5536_v17 = vsub.f32 %v5324_v16, %v326_v21  ;;  %v5541_v44 = vsub.f32 %v5461_v2, %v6905_v8  ;;  %v5544_v38 = vsub.f32 %v255_v7, %v5500_v12  ;;  %v5547_v43 = vsub.f32 %v256_v10, %v5502_v47 }
  0x52   : > { %7125 = vst [vmem:[#allocation28_spill] sm:$0xff] %v5531_v48  ;;  %v5549_v29 = vand.u32 4294901760, %v258_v54  ;;  %v4419_v15 = vpack.c.bf16 %v717_v25, %v710_v13  ;;  %v724_v20 = vand.u32 4294901760, %v723_v55  ;;  %v731_v16 = vand.u32 4294901760, %v730_v1 }
  0x53   : > { %7126 = vst [vmem:[#allocation29_spill] sm:$0xff] %v5536_v17  ;;  %7127 = vst [vmem:[#allocation30_spill] sm:$0xff] %v5544_v38  ;;  %v5552_v21 = vand.u32 4294901760, %v259_v49  ;;  %v737_v7 = vsub.f32 %v5482_v32, %v6907_v3  ;;  %v744_v10 = vsub.f32 %v5487_v33, %v6908_v4  ;;  %v399_v25 = vand.u32 4294901760, %v398_v41  ;;  %v261_v3 = vld [vmem:[%s5282_s28 + $0x60] sm:$0xff]  ;;  %v262_v4 = vld [vmem:[%s5282_s28 + $0x68] sm:$0xff] }
  0x54   : > { %4406 = vmatpush3.bf16.msra.mxu0 %v5403_v42  ;;  %7128 = vst [vmem:[#allocation31_spill] sm:$0xff] %v5547_v43  ;;  %v5566_v55 = vsub.f32 %v5477_v26, %v6909_v61  ;;  %v5569_v1 = vsub.f32 %v257_v9, %v5526_v6  ;;  %v409_v13 = vand.u32 4294901760, %v408_v62  ;;  %v5574_v8 = vsub.f32 %v258_v54, %v5549_v29 }
  0x55   : > { %4408 = vmatprep.subr.bf16.mxu0 %v5441_v58  ;;  %v419_v41 = vand.u32 4294901760, %v5524_v5  ;;  %v429_v61 = vand.u32 4294901760, %v5541_v44  ;;  %v738_v62 = vand.u32 4294901760, %v737_v7  ;;  %v745_v9 = vand.u32 4294901760, %v744_v10 }
  0x56   : > { %7129 = vst [vmem:[#allocation32_spill] sm:$0xff] %v5569_v1  ;;  %7130 = vst [vmem:[#allocation33_spill] sm:$0xff] %v5574_v8  ;;  %v7132_v54 = vand.u32 4294901760, %v5531_v48  ;;  %v439_v44 = vand.u32 4294901760, %v5566_v55  ;;  %v7136_v10 = vand.u32 4294901760, %v5544_v38  ;;  %v7137_v27 = vand.u32 4294901760, %v5547_v43 }
  0x57   : > { %v7138_v26 = vand.u32 4294901760, %v5348_v23  ;;  %v7154_v14 = vand.u32 4294901760, %v5373_v31 }
  0x58   : > { %4410 = vmatpush3.bf16.msra.mxu0 %v5441_v58  ;;  %v5581_v58 = vsub.f32 %v259_v49, %v5552_v21  ;;  %v751_v42 = vsub.f32 %v5531_v48, %v7132_v54  ;;  %v5593_v49 = vand.u32 4294901760, %v260_v28  ;;  %v448_v54 = vsub.f32 %v5544_v38, %v7136_v10  ;;  %v264_v38 = vld [vmem:[%s5282_s28 + $0x78] sm:$0xff] }
  0x59   : > { %4412 = vmatprep.subr.bf16.mxu0 %v5457_v0  ;;  %v5613_v19 = vsub.f32 %v5348_v23, %v7138_v26  ;;  %v4427_v10 = vpack.c.bf16 %v745_v9, %v738_v62  ;;  %v7142_v23 = vand.u32 4294901760, %v5569_v1  ;;  %v7145_v9 = vand.u32 4294901760, %v5574_v8 }
  0x5a   : > { %7131 = vst [vmem:[#allocation34_spill] sm:$0xff] %v5581_v58  ;;  %v752_v55 = vand.u32 4294901760, %v751_v42  ;;  %v449_v42 = vand.u32 4294901760, %v448_v54 }
  0x5b   : > { %7139 = vst [vmem:[#allocation36_spill] sm:$0xff] %v5613_v19  ;;  %v6937_v2 = vand.u32 4294901760, %v5613_v19  ;;  %v468_v26 = vsub.f32 %v5569_v1, %v7142_v23  ;;  %v265_v23 = vld [vmem:[%s5282_s28 + $0x80] sm:$0xff]  ;;  %v7146_v1 = vand.u32 4294901760, %v5581_v58 }
  0x5c   : > { %4414 = vmatpush3.bf16.msra.mxu0 %v5457_v0  ;;  %v4423_v0 = vpack.c.bf16 %v731_v16, %v724_v20  ;;  %v7134_v16 = vand.u32 4294901760, %v5343_v22  ;;  %v263_v20 = vld [vmem:[%s5282_s28 + $0x70] sm:$0xff] }
  0x5d   : > { %4416 = vmatprep.subr.bf16.mxu0 %v5493_v35 }
  0x5e   : > { %v5598_v7 = vsub.f32 %v5343_v22, %v7134_v16  ;;  %v5618_v16 = vand.u32 4294901760, %v262_v4 }
  0x60   : > { %4418 = vmatpush3.bf16.msra.mxu0 %v5493_v35  ;;  %v7133_v35 = vand.u32 4294901760, %v5536_v17  ;;  %7135 = vst [vmem:[#allocation35_spill] sm:$0xff] %v5598_v7  ;;  %7141 = vst [vmem:[#allocation38_spill] sm:$0xff] %v5618_v16 }
  0x61   : > { %4420 = vmatprep.subr.bf16.mxu0 %v4419_v15 }
  0x62   : > { %v758_v5 = vsub.f32 %v5536_v17, %v7133_v35  ;;  %v5606_v35 = vsub.f32 %v5547_v43, %v7137_v27  ;;  %v6932_v27 = vand.u32 4294901760, %v5598_v7 }
  0x63   : > { %3940 = vmatmul.mubr.f32.vlgmr.msra.gmra.mrb[0].mxu0 %v399_v25  ;;  %v5616_v25 = vand.u32 4294901760, %v261_v3 }
  0x64   : > { %4422 = vmatpush3.bf16.msra.mxu0 %v4419_v15  ;;  %3942 = vmatprep.mubr.f32.mxu0 %v409_v13  ;;  %v759_v43 = vand.u32 4294901760, %v758_v5  ;;  %v5627_v15 = vsub.f32 %v260_v28, %v5593_v49  ;;  %v5629_v13 = vand.u32 4294901760, %v263_v20  ;;  %v765_v22 = vsub.f32 %v5598_v7, %v6932_v27  ;;  %v266_v27 = vld [vmem:[%s5282_s28 + $0x88] sm:$0xff] }
  0x65   : > { %7140 = vst [vmem:[#allocation37_spill] sm:$0xff] %v5616_v25  ;;  %4424 = vmatprep.subr.bf16.mxu0 %v4423_v0  ;;  %v459_v62 = vand.u32 4294901760, %v5606_v35  ;;  %v5638_v5 = vsub.f32 %v5574_v8, %v7145_v9  ;;  %v772_v28 = vsub.f32 %v5613_v19, %v6937_v2  ;;  %v5650_v54 = vsub.f32 %v261_v3, %v5616_v25 }
  0x66   : > { %7143 = vst [vmem:[#allocation39_spill] sm:$0xff] %v5627_v15  ;;  %7144 = vst [vmem:[#allocation40_spill] sm:$0xff] %v5629_v13  ;;  %v5653_v35 = vsub.f32 %v262_v4, %v5618_v16  ;;  %v5655_v9 = vand.u32 4294901760, %v264_v38  ;;  %v4431_v8 = vpack.c.bf16 %v759_v43, %v752_v55  ;;  %v766_v63 = vand.u32 4294901760, %v765_v22 }
  0x67   : > { %3943 = vmatmul.mubr.f32.gmra.mrb[2].mxu0 %v419_v41  ;;  %v5647_v41 = vsub.f32 %v5581_v58, %v7146_v1  ;;  %7147 = vst [vmem:[#allocation41_spill] sm:$0xff] %v5650_v54  ;;  %v773_v2 = vand.u32 4294901760, %v772_v28  ;;  %v5666_v58 = vsub.f32 %v263_v20, %v5629_v13  ;;  %v5668_v4 = vand.u32 4294901760, %v265_v23 }
  0x68   : > { %3945 = vmatprep.mubr.f32.mxu0 %v429_v61  ;;  %4426 = vmatpush3.bf16.msra.mxu0 %v4423_v0  ;;  %7148 = vst [vmem:[#allocation42_spill] sm:$0xff] %v5653_v35  ;;  %7149 = vst [vmem:[#allocation43_spill] sm:$0xff] %v5655_v9  ;;  %v267_v61 = vld [vmem:[%s5282_s28 + $0x90] sm:$0xff]  ;;  %v7150_v0 = vand.u32 4294901760, %v5368_v30  ;;  %v5673_v43 = vsub.f32 %v5373_v31, %v7154_v14  ;;  %v469_v55 = vand.u32 4294901760, %v468_v26  ;;  %v479_v22 = vand.u32 4294901760, %v5638_v5 }
  0x69   : > { %4428 = vmatprep.subr.bf16.mxu0 %v4427_v10  ;;  %7152 = vst [vmem:[#allocation45_spill] sm:$0xff] %v5666_v58  ;;  %7153 = vst [vmem:[#allocation46_spill] sm:$0xff] %v5668_v4  ;;  %v5676_v28 = vand.u32 4294901760, %v266_v27  ;;  %v489_v20 = vand.u32 4294901760, %v5647_v41  ;;  %v5681_v3 = vand.u32 4294901760, %v267_v61  ;;  %v4435_v26 = vpack.c.bf16 %v773_v2, %v766_v63  ;;  %v269_v14 = vld [vmem:[%s5282_s28 + $0xa0] sm:$0xff] }
  0x6a   : > { %v5662_v1 = vsub.f32 %v5368_v30, %v7150_v0  ;;  %7155 = vst [vmem:[#allocation47_spill] sm:$0xff] %v5673_v43  ;;  %v5697_v0 = vsub.f32 %v265_v23, %v5668_v4  ;;  %v7161_v31 = vand.u32 4294901760, %v5673_v43  ;;  %v5706_v2 = vand.u32 4294901760, %v268_v59 }
  0x6b   : > { %3946 = vmatmul.mubr.f32.gmra.mrb[4].mxu0 %v439_v44  ;;  %7156 = vst [vmem:[#allocation48_spill] sm:$0xff] %v5676_v28  ;;  %7157 = vst [vmem:[#allocation49_spill] sm:$0xff] %v5681_v3  ;;  %v5687_v44 = vsub.f32 %v264_v38, %v5655_v9  ;;  %v5704_v63 = vsub.f32 %v266_v27, %v5676_v28  ;;  %v7166_v23 = vand.u32 4294901760, %v5650_v54  ;;  %v7168_v27 = vand.u32 4294901760, %v5391_v37 }
  0x6c   : > { %7151 = vst [vmem:[#allocation44_spill] sm:$0xff] %v5662_v1  ;;  %v6944_v30 = vand.u32 4294901760, %v5662_v1  ;;  %3948 = vmatprep.mubr.f32.mxu0 %v449_v42  ;;  %4430 = vmatpush3.bf16.msra.mxu0 %v4427_v10  ;;  %v7159_v42 = vand.u32 4294901760, %v5627_v15  ;;  %7160 = vst [vmem:[#allocation51_spill] sm:$0xff] %v5697_v0  ;;  %v786_v38 = vsub.f32 %v5673_v43, %v7161_v31 }
  0x6d   : > { %4432 = vmatprep.subr.bf16.mxu0 %v4431_v8  ;;  %7158 = vst [vmem:[#allocation50_spill] sm:$0xff] %v5687_v44  ;;  %7162 = vst [vmem:[#allocation52_spill] sm:$0xff] %v5704_v63  ;;  %v5717_v31 = vsub.f32 %v267_v61, %v5681_v3  ;;  %v5722_v52 = vsub.f32 %v5391_v37, %v7168_v27  ;;  %v7172_v61 = vand.u32 4294901760, %v5666_v58 }
  0x6e   : > { %v779_v10 = vsub.f32 %v5662_v1, %v6944_v30  ;;  %v498_v5 = vsub.f32 %v5627_v15, %v7159_v42  ;;  %7163 = vst [vmem:[#allocation53_spill] sm:$0xff] %v5706_v2  ;;  %v7164_v42 = vand.u32 4294901760, %v5386_v36  ;;  %v508_v15 = vsub.f32 %v5650_v54, %v7166_v23  ;;  %v270_v23 = vld [vmem:[%s5282_s28 + $0xa8] sm:$0xff] }
  0x6f   : > { %3949 = vmatmul.mubr.f32.gmra.mrb[6].mxu0 %v459_v62  ;;  %7167 = vst [vmem:[#allocation55_spill] sm:$0xff] %v5717_v31  ;;  %v787_v62 = vand.u32 4294901760, %v786_v38  ;;  %7169 = vst [vmem:[#allocation56_spill] sm:$0xff] %v5722_v52  ;;  %v528_v38 = vsub.f32 %v5666_v58, %v7172_v61  ;;  %v6965_v54 = vand.u32 4294901760, %v5697_v0  ;;  %v6958_v27 = vand.u32 4294901760, %v5722_v52  ;;  %v271_v61 = vld [vmem:[%s5282_s28 + $0xb0] sm:$0xff] }
  0x70   : > { %v780_v30 = vand.u32 4294901760, %v779_v10  ;;  %v5711_v41 = vsub.f32 %v5386_v36, %v7164_v42  ;;  %3951 = vmatprep.mubr.f32.mxu0 %v469_v55  ;;  %4434 = vmatpush3.bf16.msra.mxu0 %v4431_v8  ;;  %v7170_v10 = vand.u32 4294901760, %v5653_v35  ;;  %v5728_v42 = vand.u32 4294901760, %v269_v14  ;;  %v272_v58 = vld [vmem:[%s5282_s28 + $0xb8] sm:$0xff] }
  0x71   : > { %4436 = vmatprep.subr.bf16.mxu0 %v4435_v26  ;;  %v509_v3 = vand.u32 4294901760, %v508_v15  ;;  %v7174_v15 = vand.u32 4294901760, %v5687_v44 }
  0x72   : > { %7165 = vst [vmem:[#allocation54_spill] sm:$0xff] %v5711_v41  ;;  %v518_v36 = vsub.f32 %v5653_v35, %v7170_v10  ;;  %7171 = vst [vmem:[#allocation57_spill] sm:$0xff] %v5728_v42  ;;  %v6957_v8 = vand.u32 4294901760, %v5711_v41  ;;  %v4439_v37 = vpack.c.bf16 %v787_v62, %v780_v30  ;;  %v499_v10 = vand.u32 4294901760, %v498_v5 }
  0x73   : > { %3952 = vmatmul.mubr.f32.gmra.mrb[8].mxu0 %v479_v22  ;;  %v5739_v35 = vsub.f32 %v268_v59, %v5706_v2  ;;  %v5745_v62 = vand.u32 4294901760, %v270_v23  ;;  %v800_v22 = vsub.f32 %v5722_v52, %v6958_v27  ;;  %v5751_v59 = vsub.f32 %v269_v14, %v5728_v42  ;;  %v273_v42 = vld [vmem:[%s5282_s28 + $0xc0] sm:$0xff] }
  0x74   : > { %v793_v24 = vsub.f32 %v5711_v41, %v6957_v8  ;;  %3954 = vmatprep.mubr.f32.mxu0 %v489_v20  ;;  %4438 = vmatpush3.bf16.msra.mxu0 %v4435_v26  ;;  %v519_v5 = vand.u32 4294901760, %v518_v36  ;;  %v529_v20 = vand.u32 4294901760, %v528_v38  ;;  %v538_v26 = vsub.f32 %v5687_v44, %v7174_v15 }
  0x75   : > { %7173 = vst [vmem:[#allocation58_spill] sm:$0xff] %v5745_v62  ;;  %4440 = vmatprep.subr.bf16.mxu0 %v4439_v37  ;;  %v548_v30 = vsub.f32 %v5697_v0, %v6965_v54  ;;  %v801_v55 = vand.u32 4294901760, %v800_v22  ;;  %v7175_v27 = vand.u32 4294901760, %v5704_v63  ;;  %v7178_v15 = vand.u32 4294901760, %v5422_v51 }
  0x76   : > { %v794_v8 = vand.u32 4294901760, %v793_v24  ;;  %v7176_v24 = vand.u32 4294901760, %v5417_v50  ;;  %v5780_v22 = vsub.f32 %v270_v23, %v5745_v62  ;;  %v5782_v54 = vand.u32 4294901760, %v271_v61 }
  0x77   : > { %3955 = vmatmul.mubr.f32.gmra.mrb[10].mxu0 %v499_v10  ;;  %v558_v36 = vsub.f32 %v5704_v63, %v7175_v27  ;;  %v5774_v44 = vsub.f32 %v5422_v51, %v7178_v15  ;;  %v7180_v10 = vand.u32 4294901760, %v5717_v31  ;;  %v539_v15 = vand.u32 4294901760, %v538_v26 }
  0x78   : > { %v5769_v38 = vsub.f32 %v5417_v50, %v7176_v24  ;;  %3957 = vmatprep.mubr.f32.mxu0 %v509_v3  ;;  %4442 = vmatpush3.bf16.msra.mxu0 %v4439_v37  ;;  %7181 = vst [vmem:[#allocation61_spill] sm:$0xff] %v5782_v54  ;;  %v4443_v14 = vpack.c.bf16 %v801_v55, %v794_v8  ;;  %v5787_v3 = vand.u32 4294901760, %v272_v58  ;;  %v5789_v63 = vand.u32 4294901760, %v273_v42  ;;  %v274_v37 = vld [vmem:[%s5282_s28 + $0xc8] sm:$0xff] }
  0x79   : > { %7179 = vst [vmem:[#allocation60_spill] sm:$0xff] %v5774_v44  ;;  %v568_v27 = vsub.f32 %v5717_v31, %v7180_v10  ;;  %v6975_v51 = vand.u32 4294901760, %v5774_v44  ;;  %v549_v23 = vand.u32 4294901760, %v548_v30  ;;  %v559_v10 = vand.u32 4294901760, %v558_v36 }
  0x7a   : > { %7177 = vst [vmem:[#allocation59_spill] sm:$0xff] %v5769_v38  ;;  %v6972_v24 = vand.u32 4294901760, %v5769_v38  ;;  %7182 = vst [vmem:[#allocation62_spill] sm:$0xff] %v5787_v3  ;;  %4444 = vmatprep.subr.bf16.mxu0 %v4443_v14  ;;  %v7184_v50 = vand.u32 4294901760, %v5739_v35  ;;  %v5803_v30 = vsub.f32 %v271_v61, %v5782_v54  ;;  %v5817_v61 = vsub.f32 %v273_v42, %v5789_v63 }
  0x7b   : > { %7183 = vst [vmem:[#allocation63_spill] sm:$0xff] %v5789_v63  ;;  %3958 = vmatmul.mubr.f32.gmra.mrb[12].mxu0 %v519_v5  ;;  %v814_v8 = vsub.f32 %v5774_v44, %v6975_v51  ;;  %v569_v26 = vand.u32 4294901760, %v568_v27  ;;  %v7186_v5 = vand.u32 4294901760, %v5751_v59  ;;  %v5814_v27 = vsub.f32 %v272_v58, %v5787_v3 }
  0x7c   : > { %v807_v55 = vsub.f32 %v5769_v38, %v6972_v24  ;;  %3960 = vmatprep.mubr.f32.mxu0 %v529_v20  ;;  %v578_v31 = vsub.f32 %v5739_v35, %v7184_v50  ;;  %7185 = vst [vmem:[#allocation64_spill] sm:$0xff] %v5803_v30  ;;  %4446 = vmatpush3.bf16.msra.mxu0 %v4443_v14  ;;  %v275_v24 = vld [vmem:[%s5282_s28 + $0xd0] sm:$0xff]  ;;  %7188 = vst [vmem:[#allocation66_spill] sm:$0xff] %v5817_v61  ;;  %v5819_v14 = vand.u32 4294901760, %v274_v37 }
  0x7d   : > { %v588_v36 = vsub.f32 %v5751_v59, %v7186_v5  ;;  %v815_v51 = vand.u32 4294901760, %v814_v8  ;;  %v5811_v20 = vpack.c.bf16 %v5434_v57, %v5432_v56  ;;  %7187 = vst [vmem:[#allocation65_spill] sm:$0xff] %v5814_v27  ;;  %v5823_v50 = vpack.c.bf16 %v5487_v33, %v5482_v32  ;;  %v276_v33 = vld [vmem:[%s5282_s28 + $0xd8] sm:$0xff] }
  0x7e   : > { %v808_v62 = vand.u32 4294901760, %v807_v55  ;;  %7189 = vst [vmem:[#allocation67_spill] sm:$0xff] %v5819_v14  ;;  %v5827_v8 = vpack.c.bf16 %v5395_v40, %v5393_v39  ;;  %v5831_v5 = vpack.c.bf16 %v5536_v17, %v5531_v48  ;;  %v5835_v58 = vpack.c.bf16 %v5613_v19, %v5598_v7  ;;  %v280_v57 = vld [vmem:[%s5282_s28 + $0xf8] sm:$0xff] }
  0x7f   : > { %3961 = vmatmul.mubr.f32.gmra.mrb[14].mxu0 %v539_v15  ;;  %v5838_v0 = vand.u32 4294901760, %v275_v24  ;;  %v277_v15 = vld [vmem:[%s5282_s28 + $0xe0] sm:$0xff]  ;;  %v5852_v19 = vpack.c.bf16 %v5774_v44, %v5769_v38  ;;  %v5858_v7 = vsub.f32 %v274_v37, %v5819_v14  ;;  %v589_v44 = vand.u32 4294901760, %v588_v36 }
  0x80   : > { %v4447_v55 = vpack.c.bf16 %v815_v51, %v808_v62  ;;  %3963 = vmatprep.mubr.f32.mxu0 %v549_v23  ;;  %v5843_v62 = vpack.c.bf16 %v5673_v43, %v5662_v1  ;;  %v5847_v51 = vpack.c.bf16 %v5722_v52, %v5711_v41  ;;  %v7191_v23 = vand.u32 4294901760, %v5780_v22 }
  0x81   : > { %7190 = vst [vmem:[#allocation68_spill] sm:$0xff] %v5838_v0  ;;  %v579_v43 = vand.u32 4294901760, %v578_v31  ;;  %v5862_v1 = vand.u32 4294901760, %v276_v33  ;;  %v7193_v38 = vand.u32 4294901760, %v5803_v30  ;;  %v5869_v37 = vsub.f32 %v275_v24, %v5838_v0  ;;  %v278_v31 = vld [vmem:[%s5282_s28 + $0xe8] sm:$0xff] }
  0x82   : > { %4448 = vmatprep.subr.bf16.mxu0 %v4447_v55  ;;  %v598_v42 = vsub.f32 %v5780_v22, %v7191_v23  ;;  %v7195_v17 = vand.u32 4294901760, %v5814_v27  ;;  %v7196_v36 = vand.u32 4294901760, %v5817_v61  ;;  %v5885_v48 = vand.u32 4294901760, %v278_v31 }
  0x83   : > { %4450 = vmatpush3.bf16.msra.mxu0 %v4447_v55  ;;  %7192 = vst [vmem:[#allocation69_spill] sm:$0xff] %v5862_v1  ;;  %v608_v23 = vsub.f32 %v5803_v30, %v7193_v38  ;;  %v279_v55 = vld [vmem:[%s5282_s28 + $0xf0] sm:$0xff]  ;;  %v5883_v24 = vsub.f32 %v276_v33, %v5862_v1 }
  0x84   : > { %3964 = vmatmul.mubr.f32.gmra.mrb[16].mxu0 %v559_v10  ;;  %4452 = vmatprep.subr.bf16.mxu0 %v5827_v8  ;;  %v5871_v10 = vand.u32 4294901760, %v277_v15  ;;  %v599_v52 = vand.u32 4294901760, %v598_v42  ;;  %v628_v38 = vsub.f32 %v5817_v61, %v7196_v36  ;;  %7197 = vst [vmem:[#allocation71_spill] sm:$0xff] %v5885_v48  ;;  %v6997_v42 = vand.u32 4294901760, %v5869_v37 }
  0x85   : > { %3966 = vmatprep.mubr.f32.mxu0 %v569_v26  ;;  %v618_v26 = vsub.f32 %v5814_v27, %v7195_v17  ;;  %v609_v32 = vand.u32 4294901760, %v608_v23  ;;  %v7199_v17 = vand.u32 4294901760, %v5858_v7  ;;  %v6996_v33 = vand.u32 4294901760, %v5883_v24 }
  0x86   : > { %7194 = vst [vmem:[#allocation70_spill] sm:$0xff] %v5871_v10  ;;  %v5889_v41 = vsub.f32 %v277_v15, %v5871_v10  ;;  %v5899_v61 = vsub.f32 %v278_v31, %v5885_v48  ;;  %v629_v23 = vand.u32 4294901760, %v628_v38  ;;  %v648_v15 = vsub.f32 %v5869_v37, %v6997_v42 }
  0x87   : > { %v638_v56 = vsub.f32 %v5858_v7, %v7199_v17  ;;  %v619_v36 = vand.u32 4294901760, %v618_v26  ;;  %v658_v31 = vsub.f32 %v5883_v24, %v6996_v33 }
  0x88   : > { %3967 = vmatmul.mubr.f32.gmra.mrb[18].mxu0 %v579_v43  ;;  %v5891_v43 = vand.u32 4294901760, %v279_v55  ;;  %v7001_v27 = vand.u32 4294901760, %v5889_v41  ;;  %v7000_v26 = vand.u32 4294901760, %v5899_v61  ;;  %v649_v38 = vand.u32 4294901760, %v648_v15 }
  0x89   : > { %3969 = vmatprep.mubr.f32.mxu0 %v589_v44  ;;  %v5901_v44 = vand.u32 4294901760, %v280_v57 }
  0x8a   : > { %7198 = vst [vmem:[#allocation72_spill] sm:$0xff] %v5891_v43  ;;  %v5908_v30 = vsub.f32 %v279_v55, %v5891_v43  ;;  %v668_v17 = vsub.f32 %v5889_v41, %v7001_v27  ;;  %v7222_v27 = vld [vmem:[#allocation22_spill] sm:$0xff] }
  0x8b   : > { %7200 = vst [vmem:[#allocation73_spill] sm:$0xff] %v5901_v44 }
  0x8c   : > { %3970 = vmatmul.mubr.f32.gmra.mrb[20].mxu0 %v599_v52  ;;  %v639_v52 = vand.u32 4294901760, %v638_v56  ;;  %v6999_v55 = vand.u32 4294901760, %v5908_v30  ;;  %v678_v56 = vsub.f32 %v5899_v61, %v7000_v26  ;;  %v669_v42 = vand.u32 4294901760, %v668_v17  ;;  %v7211_v17 = vld [vmem:[#allocation24_spill] sm:$0xff]  ;;  %v7221_v26 = vld [vmem:[#allocation41_spill] sm:$0xff] }
  0x8d   : > { %3972 = vmatprep.mubr.f32.mxu0 %v609_v32  ;;  %v5915_v32 = vsub.f32 %v280_v57, %v5901_v44 }
  0x8e   : > { %v688_v57 = vsub.f32 %v5908_v30, %v6999_v55  ;;  %v7220_v55 = vld [vmem:[#allocation39_spill] sm:$0xff] }
  0x8f   : > { %v6998_v33 = vand.u32 4294901760, %v5915_v32 }
  0x90   : > { %3973 = vmatmul.mubr.f32.gmra.mrb[22].mxu0 %v619_v36  ;;  %v659_v36 = vand.u32 4294901760, %v658_v31 }
  0x91   : > { %3975 = vmatprep.mubr.f32.mxu0 %v629_v23  ;;  %v679_v23 = vand.u32 4294901760, %v678_v56  ;;  %v698_v15 = vsub.f32 %v5915_v32, %v6998_v33  ;;  %v7213_v56 = vld [vmem:[#allocation14_spill] sm:$0xff]  ;;  %v7219_v33 = vld [vmem:[#allocation19_spill] sm:$0xff] }
  0x93   : > { %v699_v31 = vand.u32 4294901760, %v698_v15  ;;  %v7216_v15 = vld [vmem:[#allocation15_spill] sm:$0xff] }
  0x94   : > { %3976 = vmatmul.mubr.f32.gmra.mrb[24].mxu0 %v639_v52  ;;  %v689_v52 = vand.u32 4294901760, %v688_v57  ;;  %v7214_v57 = vld [vmem:[#allocation31_spill] sm:$0xff] }
  0x95   : > { %3978 = vmatprep.mubr.f32.mxu0 %v649_v38  ;;  %v7210_v38 = vld [vmem:[#allocation12_spill] sm:$0xff] }
  0x98   : > { %3979 = vmatmul.mubr.f32.gmra.mrb[26].mxu0 %v659_v36  ;;  %v7212_v36 = vld [vmem:[#allocation30_spill] sm:$0xff] }
  0x99   : > { %3981 = vmatprep.mubr.f32.mxu0 %v669_v42  ;;  %v7209_v42 = vld [vmem:[#allocation23_spill] sm:$0xff] }
  0x9c   : > { %3982 = vmatmul.mubr.f32.gmra.mrb[28].mxu0 %v679_v23  ;;  %v7215_v23 = vld [vmem:[#allocation32_spill] sm:$0xff] }
  0x9d   : > { %3984 = vmatprep.mubr.f32.mxu0 %v689_v52  ;;  %v7217_v52 = vld [vmem:[#allocation33_spill] sm:$0xff] }
  0xa0   : > { %3985 = vmatmul.mubr.f32.gmra.mrb[30].mxu0 %v699_v31  ;;  %v7218_v31 = vld [vmem:[#allocation34_spill] sm:$0xff] }
  0xa1   : > { %4019 = vmatprep.mubr.f32.mxu0 %v5329_v18 }
  0xa4   : > { %4020 = vmatmul.mubr.f32.vlgmr.msra.gmra.mrb[0].mxu0 %v5379_v34 }
  0xa5   : > { %4454 = vmatpush3.bf16.msra.mxu0 %v5827_v8  ;;  %4022 = vmatprep.mubr.f32.mxu0 %v5407_v45  ;;  %v7203_v8 = vld [vmem:[#allocation58_spill] sm:$0xff] }
  0xa6   : > { %4456 = vmatprep.subr.bf16.mxu0 %v5811_v20 }
  0xa8   : > { %4023 = vmatmul.mubr.f32.gmra.mrb[2].mxu0 %v5409_v46 }
  0xa9   : > { %4025 = vmatprep.mubr.f32.mxu0 %v5427_v53  ;;  %4458 = vmatpush3.bf16.msra.mxu0 %v5811_v20  ;;  %v7201_v20 = vld [vmem:[#allocation49_spill] sm:$0xff] }
  0xaa   : > { %4460 = vmatprep.subr.bf16.mxu0 %v5823_v50 }
  0xac   : > { %4026 = vmatmul.mubr.f32.gmra.mrb[4].mxu0 %v5446_v60 }
  0xad   : > { %4028 = vmatprep.mubr.f32.mxu0 %v5500_v12  ;;  %4462 = vmatpush3.bf16.msra.mxu0 %v5823_v50  ;;  %v7202_v50 = vld [vmem:[#allocation57_spill] sm:$0xff] }
  0xae   : > { %4464 = vmatprep.subr.bf16.mxu0 %v5831_v5 }
  0xb0   : > { %4029 = vmatmul.mubr.f32.gmra.mrb[6].mxu0 %v5502_v47 }
  0xb1   : > { %4031 = vmatprep.mubr.f32.mxu0 %v5526_v6  ;;  %4466 = vmatpush3.bf16.msra.mxu0 %v5831_v5  ;;  %v7205_v5 = vld [vmem:[#allocation16_spill] sm:$0xff] }
  0xb2   : > { %4468 = vmatprep.subr.bf16.mxu0 %v5835_v58 }
  0xb4   : > { %4032 = vmatmul.mubr.f32.gmra.mrb[8].mxu0 %v5549_v29 }
  0xb5   : > { %4034 = vmatprep.mubr.f32.mxu0 %v5552_v21  ;;  %4470 = vmatpush3.bf16.msra.mxu0 %v5835_v58  ;;  %v7206_v58 = vld [vmem:[#allocation20_spill] sm:$0xff] }
  0xb6   : > { %4472 = vmatprep.subr.bf16.mxu0 %v5843_v62 }
  0xb8   : > { %4035 = vmatmul.mubr.f32.gmra.mrb[10].mxu0 %v5593_v49 }
  0xb9   : > { %4037 = vmatprep.mubr.f32.mxu0 %v5616_v25  ;;  %4474 = vmatpush3.bf16.msra.mxu0 %v5843_v62  ;;  %v7207_v62 = vld [vmem:[#allocation11_spill] sm:$0xff] }
  0xba   : > { %4476 = vmatprep.subr.bf16.mxu0 %v5847_v51 }
  0xbc   : > { %4038 = vmatmul.mubr.f32.gmra.mrb[12].mxu0 %v5618_v16  ;;  %v7244_v16 = vld [vmem:[#allocation26_spill] sm:$0xff] }
  0xbd   : > { %4040 = vmatprep.mubr.f32.mxu0 %v5629_v13  ;;  %4478 = vmatpush3.bf16.msra.mxu0 %v5847_v51  ;;  %v7208_v51 = vld [vmem:[#allocation21_spill] sm:$0xff] }
  0xbe   : > { %4480 = vmatprep.subr.bf16.mxu0 %v5852_v19 }
  0xc0   : > { %4041 = vmatmul.mubr.f32.gmra.mrb[14].mxu0 %v5655_v9  ;;  %v7241_v9 = vand.u32 4294901760, %v7206_v58 }
  0xc1   : > { %4043 = vmatprep.mubr.f32.mxu0 %v5668_v4  ;;  %4482 = vmatpush3.bf16.msra.mxu0 %v5852_v19  ;;  %v7204_v19 = vld [vmem:[#allocation13_spill] sm:$0xff]  ;;  %v7240_v4 = vand.u32 4294901760, %v7205_v5 }
  0xc2   : > { %4484 = vmatprep.subr.bf16.mxu0 %v5310_v11 }
  0xc4   : > { %4044 = vmatmul.mubr.f32.gmra.mrb[16].mxu0 %v5676_v28 }
  0xc5   : > { %4046 = vmatprep.mubr.f32.mxu0 %v7201_v20 }
  0xc8   : > { %4047 = vmatmul.mubr.f32.gmra.mrb[18].mxu0 %v5706_v2  ;;  %v7238_v2 = vld [vmem:[#allocation18_spill] sm:$0xff] }
  0xc9   : > { %4049 = vmatprep.mubr.f32.mxu0 %v7202_v50  ;;  %v7239_v20 = vand.u32 4294901760, %v7238_v2  ;;  %v7248_v2 = vld [vmem:[#allocation28_spill] sm:$0xff] }
  0xcc   : > { %4050 = vmatmul.mubr.f32.gmra.mrb[20].mxu0 %v7203_v8  ;;  %v7236_v8 = vld [vmem:[#allocation17_spill] sm:$0xff] }
  0xcd   : > { %4052 = vmatprep.mubr.f32.mxu0 %v5782_v54  ;;  %v7231_v54 = vld [vmem:[#allocation55_spill] sm:$0xff]  ;;  %v7237_v50 = vand.u32 4294901760, %v7236_v8  ;;  %v7247_v8 = vand.u32 4294901760, %v7209_v42 }
  0xcf   : > { %v4519_v28 = vpack.c.bf16 %v7239_v20, %v7237_v50 }
  0xd0   : > { %4053 = vmatmul.mubr.f32.gmra.mrb[22].mxu0 %v5787_v3  ;;  %v7230_v3 = vld [vmem:[#allocation52_spill] sm:$0xff] }
  0xd1   : > { %4055 = vmatprep.mubr.f32.mxu0 %v5789_v63  ;;  %v7229_v63 = vld [vmem:[#allocation51_spill] sm:$0xff] }
  0xd4   : > { %4056 = vmatmul.mubr.f32.gmra.mrb[24].mxu0 %v5819_v14  ;;  %v7228_v14 = vld [vmem:[#allocation50_spill] sm:$0xff] }
  0xd5   : > { %4058 = vmatprep.mubr.f32.mxu0 %v5838_v0 }
  0xd8   : > { %4059 = vmatmul.mubr.f32.gmra.mrb[26].mxu0 %v5862_v1  ;;  %v7227_v1 = vand.u32 4294901760, %v5395_v40  ;;  %v7233_v40 = vld [vmem:[#allocation65_spill] sm:$0xff] }
  0xd9   : > { %4061 = vmatprep.mubr.f32.mxu0 %v5871_v10  ;;  %v7226_v10 = vand.u32 4294901760, %v5393_v39  ;;  %v7232_v39 = vld [vmem:[#allocation64_spill] sm:$0xff] }
  0xdb   : > { %v4515_v0 = vpack.c.bf16 %v7227_v1, %v7226_v10  ;;  %v7234_v1 = vld [vmem:[#allocation66_spill] sm:$0xff]  ;;  %v7235_v10 = vand.u32 4294901760, %v7204_v19 }
  0xdc   : > { %4062 = vmatmul.mubr.f32.gmra.mrb[28].mxu0 %v5885_v48  ;;  %v7225_v48 = vld [vmem:[#allocation27_spill] sm:$0xff] }
  0xdd   : > { %4064 = vmatprep.mubr.f32.mxu0 %v5891_v43  ;;  %v7224_v43 = vld [vmem:[#allocation45_spill] sm:$0xff] }
  0xe0   : > { %4065 = vmatmul.mubr.f32.gmra.mrb[30].mxu0 %v5901_v44  ;;  %v7223_v44 = vld [vmem:[#allocation42_spill] sm:$0xff] }
  0xe1   : > { %4099 = vmatprep.mubr.f32.mxu0 %v7204_v19  ;;  %v7246_v19 = vand.u32 4294901760, %v7208_v51 }
  0xe4   : > { %4100 = vmatmul.mubr.f32.vlgmr.msra.gmra.mrb[0].mxu0 %v7205_v5 }
  0xe5   : > { %4486 = vmatpush3.bf16.msra.mxu0 %v5310_v11  ;;  %4102 = vmatprep.mubr.f32.mxu0 %v7206_v58 }
  0xe6   : > { %4488 = vmatprep.subr.bf16.mxu0 %v7207_v62 }
  0xe8   : > { %4103 = vmatmul.mubr.f32.gmra.mrb[2].mxu0 %v7208_v51  ;;  %v7259_v51 = vand.u32 4294901760, %v7215_v23 }
  0xe9   : > { %4105 = vmatprep.mubr.f32.mxu0 %v7209_v42  ;;  %4490 = vmatpush3.bf16.msra.mxu0 %v7207_v62  ;;  %v7260_v42 = vld [vmem:[#allocation44_spill] sm:$0xff] }
  0xea   : > { %4492 = vmatprep.subr.bf16.mxu0 %v7210_v38 }
  0xec   : > { %4106 = vmatmul.mubr.f32.gmra.mrb[4].mxu0 %v7211_v17 }
  0xed   : > { %4108 = vmatprep.mubr.f32.mxu0 %v7212_v36  ;;  %4494 = vmatpush3.bf16.msra.mxu0 %v7210_v38 }
  0xee   : > { %4496 = vmatprep.subr.bf16.mxu0 %v7213_v56 }
  0xf0   : > { %4109 = vmatmul.mubr.f32.gmra.mrb[6].mxu0 %v7214_v57 }
  0xf1   : > { %4111 = vmatprep.mubr.f32.mxu0 %v7215_v23  ;;  %4498 = vmatpush3.bf16.msra.mxu0 %v7213_v56 }
  0xf2   : > { %4500 = vmatprep.subr.bf16.mxu0 %v7216_v15 }
  0xf4   : > { %4112 = vmatmul.mubr.f32.gmra.mrb[8].mxu0 %v7217_v52 }
  0xf5   : > { %4114 = vmatprep.mubr.f32.mxu0 %v7218_v31  ;;  %4502 = vmatpush3.bf16.msra.mxu0 %v7216_v15 }
  0xf6   : > { %4504 = vmatprep.subr.bf16.mxu0 %v7219_v33 }
  0xf8   : > { %4115 = vmatmul.mubr.f32.gmra.mrb[10].mxu0 %v7220_v55 }
  0xf9   : > { %4117 = vmatprep.mubr.f32.mxu0 %v7221_v26  ;;  %4506 = vmatpush3.bf16.msra.mxu0 %v7219_v33 }
  0xfa   : > { %4508 = vmatprep.subr.bf16.mxu0 %v7222_v27 }
  0xfc   : > { %4118 = vmatmul.mubr.f32.gmra.mrb[12].mxu0 %v7223_v44 }
  0xfd   : > { %4120 = vmatprep.mubr.f32.mxu0 %v7224_v43  ;;  %4510 = vmatpush3.bf16.msra.mxu0 %v7222_v27  ;;  %v7245_v27 = vand.u32 4294901760, %v7244_v16  ;;  %v7254_v16 = vld [vmem:[#allocation35_spill] sm:$0xff] }
  0xfe   : > { %4512 = vmatprep.subr.bf16.mxu0 %v7225_v48 }
 0x100   : > { %4121 = vmatmul.mubr.f32.gmra.mrb[14].mxu0 %v7228_v14 }
 0x101   : > { %4123 = vmatprep.mubr.f32.mxu0 %v7229_v63  ;;  %4514 = vmatpush3.bf16.msra.mxu0 %v7225_v48  ;;  %v7242_v48 = vld [vmem:[#allocation25_spill] sm:$0xff] }
 0x102   : > { %4516 = vmatprep.subr.bf16.mxu0 %v4515_v0  ;;  %v7243_v13 = vand.u32 4294901760, %v7242_v48  ;;  %v7253_v48 = vand.u32 4294901760, %v7212_v36 }
 0x104   : > { %4124 = vmatmul.mubr.f32.gmra.mrb[16].mxu0 %v7230_v3  ;;  %v4523_v25 = vpack.c.bf16 %v7245_v27, %v7243_v13  ;;  %v7255_v13 = vand.u32 4294901760, %v7254_v16  ;;  %v7256_v27 = vld [vmem:[#allocation36_spill] sm:$0xff] }
 0x105   : > { %4126 = vmatprep.mubr.f32.mxu0 %v7231_v54  ;;  %v7257_v5 = vand.u32 4294901760, %v7256_v27  ;;  %v7277_v27 = vand.u32 4294901760, %v7224_v43  ;;  %v7282_v43 = vand.u32 4294901760, %v5739_v35 }
 0x107   : > { %v4531_v58 = vpack.c.bf16 %v7257_v5, %v7255_v13  ;;  %v7276_v13 = vand.u32 4294901760, %v7223_v44  ;;  %v7280_v5 = vand.u32 4294901760, %v7230_v3  ;;  %v7281_v44 = vand.u32 4294901760, %v7231_v54 }
 0x108   : > { %4127 = vmatmul.mubr.f32.gmra.mrb[18].mxu0 %v5739_v35  ;;  %v7287_v3 = vand.u32 4294901760, %v7234_v1  ;;  %v7288_v54 = vand.u32 4294901760, %v5858_v7  ;;  %v7289_v35 = vand.u32 4294901760, %v5869_v37 }
 0x109   : > { %4129 = vmatprep.mubr.f32.mxu0 %v5751_v59 }
 0x10c   : > { %4130 = vmatmul.mubr.f32.gmra.mrb[20].mxu0 %v5780_v22 }
 0x10d   : > { %4132 = vmatprep.mubr.f32.mxu0 %v7232_v39 }
 0x110   : > { %4133 = vmatmul.mubr.f32.gmra.mrb[22].mxu0 %v7233_v40 }
 0x111   : > { %4135 = vmatprep.mubr.f32.mxu0 %v7234_v1  ;;  %v7294_v1 = vand.u32 4294901760, %v5915_v32 }
 0x114   : > { %4136 = vmatmul.mubr.f32.gmra.mrb[24].mxu0 %v5858_v7  ;;  %v7296_v7 = vld [vmem:[#allocation22_spill] sm:$0xff] }
 0x115   : > { %4138 = vmatprep.mubr.f32.mxu0 %v5869_v37  ;;  %v7300_v37 = vld [vmem:[#allocation43_spill] sm:$0xff] }
 0x118   : > { %4139 = vmatmul.mubr.f32.gmra.mrb[26].mxu0 %v5883_v24 }
 0x119   : > { %4141 = vmatprep.mubr.f32.mxu0 %v5889_v41 }
 0x11c   : > { %4142 = vmatmul.mubr.f32.gmra.mrb[28].mxu0 %v5899_v61 }
 0x11d   : > { %4144 = vmatprep.mubr.f32.mxu0 %v5908_v30 }
 0x120   : > { %4145 = vmatmul.mubr.f32.gmra.mrb[30].mxu0 %v5915_v32  ;;  %v7302_v32 = vld [vmem:[#allocation48_spill] sm:$0xff] }
 0x121   : > { %4179 = vmatprep.mubr.f32.mxu0 %v7235_v10  ;;  %v7262_v10 = vld [vmem:[#allocation47_spill] sm:$0xff] }
 0x122   : > { %v7263_v36 = vand.u32 4294901760, %v7262_v10  ;;  %v7311_v10 = vld [vmem:[#allocation68_spill] sm:$0xff] }
 0x124   : > { %4180 = vmatmul.mubr.f32.vlgmr.msra.gmra.mrb[0].mxu0 %v7240_v4  ;;  %v7249_v4 = vand.u32 4294901760, %v7248_v2 }
 0x125   : > { %4518 = vmatpush3.bf16.msra.mxu0 %v4515_v0  ;;  %4182 = vmatprep.mubr.f32.mxu0 %v7241_v9  ;;  %v7250_v0 = vld [vmem:[#allocation29_spill] sm:$0xff]  ;;  %v7252_v9 = vand.u32 4294901760, %v7211_v17  ;;  %v7261_v17 = vand.u32 4294901760, %v7260_v42  ;;  %v7309_v42 = vld [vmem:[#allocation63_spill] sm:$0xff] }
 0x126   : > { %4520 = vmatprep.subr.bf16.mxu0 %v4519_v28  ;;  %v7251_v20 = vand.u32 4294901760, %v7250_v0 }
 0x128   : > { %4183 = vmatmul.mubr.f32.gmra.mrb[2].mxu0 %v7246_v19  ;;  %v4527_v50 = vpack.c.bf16 %v7251_v20, %v7249_v4  ;;  %v4535_v19 = vpack.c.bf16 %v7263_v36, %v7261_v17  ;;  %v7268_v4 = vld [vmem:[#allocation56_spill] sm:$0xff]  ;;  %v7270_v20 = vand.u32 4294901760, %v7220_v55  ;;  %v7278_v55 = vand.u32 4294901760, %v7228_v14  ;;  %v7310_v17 = vld [vmem:[#allocation67_spill] sm:$0xff]  ;;  %v7312_v36 = vld [vmem:[#allocation69_spill] sm:$0xff] }
 0x129   : > { %4185 = vmatprep.mubr.f32.mxu0 %v7247_v8  ;;  %4522 = vmatpush3.bf16.msra.mxu0 %v4519_v28  ;;  %v7258_v28 = vand.u32 4294901760, %v7214_v57  ;;  %v7265_v8 = vand.u32 4294901760, %v7218_v31  ;;  %v7266_v57 = vld [vmem:[#allocation54_spill] sm:$0xff]  ;;  %v7269_v23 = vand.u32 4294901760, %v7268_v4  ;;  %v7284_v14 = vand.u32 4294901760, %v5780_v22 }
 0x12a   : > { %4524 = vmatprep.subr.bf16.mxu0 %v4523_v25  ;;  %v7267_v2 = vand.u32 4294901760, %v7266_v57  ;;  %v7291_v22 = vand.u32 4294901760, %v5889_v41  ;;  %v7297_v41 = vld [vmem:[#allocation38_spill] sm:$0xff]  ;;  %v7316_v57 = vld [vmem:[#allocation73_spill] sm:$0xff] }
 0x12c   : > { %4186 = vmatmul.mubr.f32.gmra.mrb[4].mxu0 %v7252_v9  ;;  %v4539_v0 = vpack.c.bf16 %v7269_v23, %v7267_v2 }
 0x12d   : > { %4188 = vmatprep.mubr.f32.mxu0 %v7253_v48  ;;  %4526 = vmatpush3.bf16.msra.mxu0 %v4523_v25  ;;  %v7264_v25 = vand.u32 4294901760, %v7217_v52  ;;  %v7272_v52 = vld [vmem:[#allocation59_spill] sm:$0xff]  ;;  %v7274_v48 = vld [vmem:[#allocation60_spill] sm:$0xff] }
 0x12e   : > { %4528 = vmatprep.subr.bf16.mxu0 %v4527_v50  ;;  %v7273_v9 = vand.u32 4294901760, %v7272_v52  ;;  %v7275_v31 = vand.u32 4294901760, %v7274_v48 }
 0x130   : > { %4189 = vmatmul.mubr.f32.gmra.mrb[6].mxu0 %v7258_v28  ;;  %v4543_v16 = vpack.c.bf16 %v7275_v31, %v7273_v9  ;;  %v7286_v28 = vand.u32 4294901760, %v7233_v40  ;;  %v7293_v40 = vand.u32 4294901760, %v5908_v30  ;;  %v7298_v30 = vld [vmem:[#allocation40_spill] sm:$0xff] }
 0x131   : > { %4191 = vmatprep.mubr.f32.mxu0 %v7259_v51  ;;  %4530 = vmatpush3.bf16.msra.mxu0 %v4527_v50  ;;  %v7271_v50 = vand.u32 4294901760, %v7221_v26  ;;  %v7279_v26 = vand.u32 4294901760, %v7229_v63  ;;  %v7285_v63 = vand.u32 4294901760, %v7232_v39  ;;  %v7292_v39 = vand.u32 4294901760, %v5899_v61  ;;  %v7299_v61 = vld [vmem:[#allocation27_spill] sm:$0xff]  ;;  %v7308_v51 = vld [vmem:[#allocation62_spill] sm:$0xff] }
 0x132   : > { %4532 = vmatprep.subr.bf16.mxu0 %v4531_v58 }
 0x134   : > { %4192 = vmatmul.mubr.f32.gmra.mrb[8].mxu0 %v7264_v25  ;;  %v7314_v25 = vld [vmem:[#allocation71_spill] sm:$0xff] }
 0x135   : > { %4194 = vmatprep.mubr.f32.mxu0 %v7265_v8  ;;  %4534 = vmatpush3.bf16.msra.mxu0 %v4531_v58  ;;  %v7283_v58 = vand.u32 4294901760, %v5751_v59  ;;  %v7290_v59 = vand.u32 4294901760, %v5883_v24  ;;  %v7301_v24 = vld [vmem:[#allocation46_spill] sm:$0xff]  ;;  %v7315_v8 = vld [vmem:[#allocation72_spill] sm:$0xff] }
 0x136   : > { %4536 = vmatprep.subr.bf16.mxu0 %v4535_v19 }
 0x138   : > { %4195 = vmatmul.mubr.f32.gmra.mrb[10].mxu0 %v7270_v20 }
 0x139   : > { %4197 = vmatprep.mubr.f32.mxu0 %v7271_v50  ;;  %4538 = vmatpush3.bf16.msra.mxu0 %v4535_v19  ;;  %v7313_v19 = vld [vmem:[#allocation70_spill] sm:$0xff] }
 0x13a   : > { %4540 = vmatprep.subr.bf16.mxu0 %v4539_v0 }
 0x13c   : > { %4198 = vmatmul.mubr.f32.gmra.mrb[12].mxu0 %v7276_v13 }
 0x13d   : > { %4200 = vmatprep.mubr.f32.mxu0 %v7277_v27  ;;  %4542 = vmatpush3.bf16.msra.mxu0 %v4539_v0 }
 0x13e   : > { %4544 = vmatprep.subr.bf16.mxu0 %v4543_v16 }
 0x140   : > { %4201 = vmatmul.mubr.f32.gmra.mrb[14].mxu0 %v7278_v55 }
 0x141   : > { %4203 = vmatprep.mubr.f32.mxu0 %v7279_v26  ;;  %4546 = vmatpush3.bf16.msra.mxu0 %v4543_v16 }
 0x142   : > { %4548 = vmatprep.subr.bf16.mxu0 %v5310_v11 }
 0x144   : > { %4204 = vmatmul.mubr.f32.gmra.mrb[16].mxu0 %v7280_v5 }
 0x145   : > { %4206 = vmatprep.mubr.f32.mxu0 %v7281_v44 }
 0x148   : > { %4207 = vmatmul.mubr.f32.gmra.mrb[18].mxu0 %v7282_v43 }
 0x149   : > { %4209 = vmatprep.mubr.f32.mxu0 %v7283_v58 }
 0x14c   : > { %4210 = vmatmul.mubr.f32.gmra.mrb[20].mxu0 %v7284_v14 }
 0x14d   : > { %4212 = vmatprep.mubr.f32.mxu0 %v7285_v63 }
 0x150   : > { %4213 = vmatmul.mubr.f32.gmra.mrb[22].mxu0 %v7286_v28 }
 0x151   : > { %4215 = vmatprep.mubr.f32.mxu0 %v7287_v3 }
 0x154   : > { %4216 = vmatmul.mubr.f32.gmra.mrb[24].mxu0 %v7288_v54 }
 0x155   : > { %4218 = vmatprep.mubr.f32.mxu0 %v7289_v35 }
 0x158   : > { %4219 = vmatmul.mubr.f32.gmra.mrb[26].mxu0 %v7290_v59 }
 0x159   : > { %4221 = vmatprep.mubr.f32.mxu0 %v7291_v22 }
 0x15c   : > { %4222 = vmatmul.mubr.f32.gmra.mrb[28].mxu0 %v7292_v39 }
 0x15d   : > { %4224 = vmatprep.mubr.f32.mxu0 %v7293_v40 }
 0x160   : > { %4225 = vmatmul.mubr.f32.gmra.mrb[30].mxu0 %v7294_v1 }
 0x161   : > { %4259 = vmatprep.mubr.f32.mxu0 %v5329_v18 }
 0x164   : > { %4260 = vmatmul.mubr.f32.vlgmr.msra.gmra.mrb[0].mxu0 %v5379_v34 }
 0x165   : > { %4550 = vmatpush3.bf16.msra.mxu0 %v5310_v11  ;;  %4262 = vmatprep.mubr.f32.mxu0 %v5407_v45  ;;  %v7295_v11 = vld [vmem:[#allocation37_spill] sm:$0xff] }
 0x166   : > { %4552 = vmatprep.subr.bf16.mxu0 %v7207_v62 }
 0x168   : > { %4263 = vmatmul.mubr.f32.gmra.mrb[2].mxu0 %v5409_v46 }
 0x169   : > { %4265 = vmatprep.mubr.f32.mxu0 %v5427_v53  ;;  %4554 = vmatpush3.bf16.msra.mxu0 %v7207_v62  ;;  %v7303_v62 = vld [vmem:[#allocation49_spill] sm:$0xff] }
 0x16a   : > { %4556 = vmatprep.subr.bf16.mxu0 %v7210_v38 }
 0x16c   : > { %4266 = vmatmul.mubr.f32.gmra.mrb[4].mxu0 %v5446_v60 }
 0x16d   : > { %4268 = vmatprep.mubr.f32.mxu0 %v5500_v12  ;;  %4558 = vmatpush3.bf16.msra.mxu0 %v7210_v38  ;;  %v7305_v38 = vld [vmem:[#allocation57_spill] sm:$0xff] }
 0x16e   : > { %4560 = vmatprep.subr.bf16.mxu0 %v7213_v56 }
 0x170   : > { %4269 = vmatmul.mubr.f32.gmra.mrb[6].mxu0 %v5502_v47 }
 0x171   : > { %4271 = vmatprep.mubr.f32.mxu0 %v5526_v6  ;;  %4562 = vmatpush3.bf16.msra.mxu0 %v7213_v56  ;;  %v7306_v56 = vld [vmem:[#allocation58_spill] sm:$0xff] }
 0x172   : > { %4564 = vmatprep.subr.bf16.mxu0 %v7216_v15 }
 0x174   : > { %4272 = vmatmul.mubr.f32.gmra.mrb[8].mxu0 %v5549_v29 }
 0x175   : > { %4274 = vmatprep.mubr.f32.mxu0 %v5552_v21  ;;  %4566 = vmatpush3.bf16.msra.mxu0 %v7216_v15  ;;  %v7307_v15 = vld [vmem:[#allocation61_spill] sm:$0xff] }
 0x176   : > { %4568 = vmatprep.subr.bf16.mxu0 %v7219_v33 }
 0x178   : > { %4275 = vmatmul.mubr.f32.gmra.mrb[10].mxu0 %v5593_v49 }
 0x179   : > { %4277 = vmatprep.mubr.f32.mxu0 %v7295_v11  ;;  %4570 = vmatpush3.bf16.msra.mxu0 %v7219_v33  ;;  %v7304_v33 = vld [vmem:[#allocation53_spill] sm:$0xff] }
 0x17a   : > { %4572 = vmatprep.subr.bf16.mxu0 %v7296_v7 }
 0x17c   : > { %4278 = vmatmul.mubr.f32.gmra.mrb[12].mxu0 %v7297_v41 }
 0x17d   : > { %4280 = vmatprep.mubr.f32.mxu0 %v7298_v30  ;;  %4574 = vmatpush3.bf16.msra.mxu0 %v7296_v7 }
 0x17e   : > { %4576 = vmatprep.subr.bf16.mxu0 %v7299_v61 }
 0x180   : > { %4281 = vmatmul.mubr.f32.gmra.mrb[14].mxu0 %v7300_v37 }
 0x181   : > { %4283 = vmatprep.mubr.f32.mxu0 %v7301_v24  ;;  %4578 = vmatpush3.bf16.msra.mxu0 %v7299_v61 }
 0x184   : > { %4284 = vmatmul.mubr.f32.gmra.mrb[16].mxu0 %v7302_v32 }
 0x185   : > { %4286 = vmatprep.mubr.f32.mxu0 %v7303_v62 }
 0x188   : > { %4287 = vmatmul.mubr.f32.gmra.mrb[18].mxu0 %v7304_v33 }
 0x189   : > { %4289 = vmatprep.mubr.f32.mxu0 %v7305_v38 }
 0x18c   : > { %4290 = vmatmul.mubr.f32.gmra.mrb[20].mxu0 %v7306_v56 }
 0x18d   : > { %4292 = vmatprep.mubr.f32.mxu0 %v7307_v15 }
 0x190   : > { %4293 = vmatmul.mubr.f32.gmra.mrb[22].mxu0 %v7308_v51 }
 0x191   : > { %4295 = vmatprep.mubr.f32.mxu0 %v7309_v42 }
 0x194   : > { %4296 = vmatmul.mubr.f32.gmra.mrb[24].mxu0 %v7310_v17 }
 0x195   : > { %4298 = vmatprep.mubr.f32.mxu0 %v7311_v10 }
 0x198   : > { %4299 = vmatmul.mubr.f32.gmra.mrb[26].mxu0 %v7312_v36 }
 0x199   : > { %4301 = vmatprep.mubr.f32.mxu0 %v7313_v19 }
 0x19c   : > { %4302 = vmatmul.mubr.f32.gmra.mrb[28].mxu0 %v7314_v25 }
 0x19d   : > { %4304 = vmatprep.mubr.f32.mxu0 %v7315_v8 }
 0x1a0   : > { %4305 = vmatmul.mubr.f32.gmra.mrb[30].mxu0 %v7316_v57 }
 0x1a1   : > { %4339 = vmatprep.mubr.f32.mxu0 %v5329_v18  ;;  %v2310_v18 = vld [vmem:[%s6886_s4] sm:$0xff] }
 0x1a4   : > { %4340 = vmatmul.mubr.f32.vlgmr.msra.gmra.mrb[0].mxu0 %v5379_v34 }
 0x1a5   : > { %4342 = vmatprep.mubr.f32.mxu0 %v5407_v45 }
 0x1a8   : > { %4343 = vmatmul.mubr.f32.gmra.mrb[2].mxu0 %v5409_v46 }
 0x1a9   : > { %4345 = vmatprep.mubr.f32.mxu0 %v5427_v53 }
 0x1ac   : > { %4346 = vmatmul.mubr.f32.gmra.mrb[4].mxu0 %v5446_v60 }
 0x1ad   : > { %4348 = vmatprep.mubr.f32.mxu0 %v5500_v12 }
 0x1b0   : > { %4349 = vmatmul.mubr.f32.gmra.mrb[6].mxu0 %v5502_v47 }
 0x1b1   : > { %4351 = vmatprep.mubr.f32.mxu0 %v5526_v6  ;;  %v6222_v6 = vld [vmem:[%s6885_s3] ss:$0 sm:$0xff] }
 0x1b4   : > { %4352 = vmatmul.mubr.f32.gmra.mrb[8].mxu0 %v5549_v29  ;;  %v2313_v29 = vsel %vm2311_vm0, %v2310_v18, 0 }
 0x1b5   : > { %4354 = vmatprep.mubr.f32.mxu0 %v5552_v21  ;;  %v6206_v34 = vand.u32 4294901760, %v2313_v29 }
 0x1b7   : > { %7317 = vst [vmem:[#allocation13_spill] sm:$0xff] %v6206_v34  ;;  %v6209_v45 = vsub.f32 %v2313_v29, %v6206_v34 }
 0x1b8   : > { %4355 = vmatmul.mubr.f32.gmra.mrb[10].mxu0 %v5593_v49 }
 0x1b9   : > { %4357 = vmatprep.mubr.f32.mxu0 %v7295_v11  ;;  %7318 = vst [vmem:[#allocation16_spill] sm:$0xff] %v6209_v45  ;;  %v6212_v46 = vand.u32 4294901760, %v6209_v45 }
 0x1bb   : > { %7319 = vst [vmem:[#allocation20_spill] sm:$0xff] %v6212_v46  ;;  %v2511_v53 = vsub.f32 %v6209_v45, %v6212_v46 }
 0x1bc   : > { %4358 = vmatmul.mubr.f32.gmra.mrb[12].mxu0 %v7297_v41 }
 0x1bd   : > { %4360 = vmatprep.mubr.f32.mxu0 %v7298_v30  ;;  %v6216_v60 = vand.u32 4294901760, %v2511_v53 }
 0x1bf   : > { %7320 = vst [vmem:[#allocation11_spill] sm:$0xff] %v6216_v60  ;;  %3735 = vmatprep.mubr.f32.mxu1 %v6216_v60 }
 0x1c0   : > { %4361 = vmatmul.mubr.f32.gmra.mrb[14].mxu0 %v7300_v37 }
 0x1c1   : > { %4363 = vmatprep.mubr.f32.mxu0 %v7301_v24 }
 0x1c4   : > { %4364 = vmatmul.mubr.f32.gmra.mrb[16].mxu0 %v7302_v32 }
 0x1c5   : > { %4366 = vmatprep.mubr.f32.mxu0 %v7303_v62 }
 0x1c8   : > { %4367 = vmatmul.mubr.f32.gmra.mrb[18].mxu0 %v7304_v33 }
 0x1c9   : > { %4369 = vmatprep.mubr.f32.mxu0 %v7305_v38 }
 0x1cc   : > { %4370 = vmatmul.mubr.f32.gmra.mrb[20].mxu0 %v7306_v56 }
 0x1cd   : > { %4372 = vmatprep.mubr.f32.mxu0 %v7307_v15 }
 0x1d0   : > { %4373 = vmatmul.mubr.f32.gmra.mrb[22].mxu0 %v7308_v51 }
 0x1d1   : > { %4375 = vmatprep.mubr.f32.mxu0 %v7309_v42 }
 0x1d4   : > { %4376 = vmatmul.mubr.f32.gmra.mrb[24].mxu0 %v7310_v17 }
 0x1d5   : > { %4378 = vmatprep.mubr.f32.mxu0 %v7311_v10 }
 0x1d8   : > { %4379 = vmatmul.mubr.f32.gmra.mrb[26].mxu0 %v7312_v36 }
 0x1d9   : > { %4381 = vmatprep.mubr.f32.mxu0 %v7313_v19 }
 0x1dc   : > { %4382 = vmatmul.mubr.f32.gmra.mrb[28].mxu0 %v7314_v25 }
 0x1dd   : > { %4384 = vmatprep.mubr.f32.mxu0 %v7315_v8 }
 0x1e0   : > { %4385 = vmatmul.mubr.f32.gmra.mrb[30].mxu0 %v7316_v57 }
 0x277   : > { %v4341_v12 = vpop.f32.mrb[0].mxu0 }
 0x278   : > { %v4771_v47 = vadd.f32 %v4341_v12, %v6222_v6  ;;  %v2088_v21 = vpop.f32.mrb[1].mxu0 }
 0x279   : > { %v4772_v49 = vadd.f32 %v6222_v6, %v2088_v21 }
 0x27a   : > { %v2279_v2 = vmax.f32 %v4771_v47, 0.0 }
 0x27b   : > { %v2278_v4 = vmax.f32 %v4772_v49, 0.0  ;;  %v4344_v23 = vpop.f32.mrb[2].mxu0 }
 0x27c   : > { %v2319_v0 = vsel %vm2311_vm0, %v2279_v2, 0  ;;  %v4773_v20 = vadd.f32 %v4344_v23, %v6222_v6  ;;  %v2100_v50 = vpop.f32.mrb[3].mxu0 }
 0x27d   : > { %v2415_v52 = vand.u32 4294901760, %v2319_v0  ;;  %v2316_v9 = vsel %vm2311_vm0, %v2278_v4, 0  ;;  %v4774_v48 = vadd.f32 %v6222_v6, %v2100_v50 }
 0x27e   : > { %v2412_v31 = vand.u32 4294901760, %v2316_v9  ;;  %v2281_v16 = vmax.f32 %v4773_v20, 0.0 }
 0x27f   : > { %v6230_v13 = vsub.f32 %v2319_v0, %v2415_v52  ;;  %v2280_v27 = vmax.f32 %v4774_v48, 0.0  ;;  %v4347_v55 = vpop.f32.mrb[4].mxu0 }
 0x280   : > { %v6232_v26 = vsub.f32 %v2316_v9, %v2412_v31  ;;  %v2325_v5 = vsel %vm2311_vm0, %v2281_v16, 0  ;;  %v4775_v44 = vadd.f32 %v4347_v55, %v6222_v6  ;;  %v2112_v43 = vpop.f32.mrb[5].mxu0  ;;  %v6236_v58 = vpack.c.bf16 %v2415_v52, %v2412_v31 }
 0x281   : > { %7321 = vst [vmem:[#allocation21_spill] sm:$0xff] %v6230_v13  ;;  %v7040_v14 = vand.u32 4294901760, %v6230_v13  ;;  %v2421_v63 = vand.u32 4294901760, %v2325_v5  ;;  %v2322_v28 = vsel %vm2311_vm0, %v2280_v27, 0  ;;  %v4776_v3 = vadd.f32 %v6222_v6, %v2112_v43 }
 0x282   : > { %7322 = vst [vmem:[#allocation23_spill] sm:$0xff] %v6232_v26  ;;  %7323 = vst [vmem:[#allocation12_spill] sm:$0xff] %v6236_v58  ;;  %v7041_v54 = vand.u32 4294901760, %v6232_v26  ;;  %v2418_v35 = vand.u32 4294901760, %v2322_v28  ;;  %v2283_v59 = vmax.f32 %v4775_v44, 0.0 }
 0x283   : > { %v6247_v39 = vsub.f32 %v6230_v13, %v7040_v14  ;;  %v6249_v40 = vsub.f32 %v2325_v5, %v2421_v63  ;;  %v2282_v1 = vmax.f32 %v4776_v3, 0.0  ;;  %v4350_v11 = vpop.f32.mrb[6].mxu0 }
 0x284   : > { %v6254_v7 = vsub.f32 %v6232_v26, %v7041_v54  ;;  %v6256_v41 = vsub.f32 %v2322_v28, %v2418_v35  ;;  %v2331_v30 = vsel %vm2311_vm0, %v2283_v59, 0  ;;  %v4777_v61 = vadd.f32 %v4350_v11, %v6222_v6  ;;  %v2124_v37 = vpop.f32.mrb[7].mxu0 }
 0x285   : > { %7324 = vst [vmem:[#allocation24_spill] sm:$0xff] %v6249_v40  ;;  %v7038_v32 = vand.u32 4294901760, %v6249_v40  ;;  %v2427_v62 = vand.u32 4294901760, %v2331_v30  ;;  %v2328_v33 = vsel %vm2311_vm0, %v2282_v1, 0  ;;  %v4778_v10 = vadd.f32 %v6222_v6, %v2124_v37 }
 0x286   : > { %7325 = vst [vmem:[#allocation30_spill] sm:$0xff] %v6256_v41  ;;  %v7039_v56 = vand.u32 4294901760, %v6256_v41  ;;  %v2424_v15 = vand.u32 4294901760, %v2328_v33  ;;  %v2285_v51 = vmax.f32 %v4777_v61, 0.0  ;;  %v6273_v19 = vpack.c.bf16 %v2421_v63, %v2418_v35 }
 0x287   : > { %v6268_v42 = vsub.f32 %v6249_v40, %v7038_v32  ;;  %v6270_v17 = vsub.f32 %v2331_v30, %v2427_v62  ;;  %v4353_v36 = vpop.f32.mrb[8].mxu0  ;;  %v2284_v21 = vmax.f32 %v4778_v10, 0.0 }
 0x288   : > { %7326 = vst [vmem:[#allocation14_spill] sm:$0xff] %v6273_v19  ;;  %v6278_v25 = vsub.f32 %v6256_v41, %v7039_v56  ;;  %v6280_v8 = vsub.f32 %v2328_v33, %v2424_v15  ;;  %v2337_v57 = vsel %vm2311_vm0, %v2285_v51, 0  ;;  %v4779_v18 = vadd.f32 %v4353_v36, %v6222_v6  ;;  %v2136_v29 = vpop.f32.mrb[9].mxu0 }
 0x289   : > { %v7046_v12 = vand.u32 4294901760, %v6270_v17  ;;  %v2433_v47 = vand.u32 4294901760, %v2337_v57  ;;  %v4780_v23 = vadd.f32 %v6222_v6, %v2136_v29  ;;  %v2334_v50 = vsel %vm2311_vm0, %v2284_v21, 0 }
 0x28a   : > { %v7048_v2 = vand.u32 4294901760, %v6280_v8  ;;  %v2287_v4 = vmax.f32 %v4779_v18, 0.0  ;;  %v6297_v9 = vpack.c.bf16 %v2427_v62, %v2424_v15  ;;  %v2430_v31 = vand.u32 4294901760, %v2334_v50 }
 0x28b   : > { %v6292_v0 = vsub.f32 %v6270_v17, %v7046_v12  ;;  %v6294_v20 = vsub.f32 %v2337_v57, %v2433_v47  ;;  %v4356_v52 = vpop.f32.mrb[10].mxu0  ;;  %v2286_v27 = vmax.f32 %v4780_v23, 0.0 }
 0x28c   : > { %7327 = vst [vmem:[#allocation31_spill] sm:$0xff] %v6297_v9  ;;  %v6302_v48 = vsub.f32 %v6280_v8, %v7048_v2  ;;  %v2343_v16 = vsel %vm2311_vm0, %v2287_v4, 0  ;;  %v2148_v55 = vpop.f32.mrb[11].mxu0  ;;  %v4781_v63 = vadd.f32 %v4356_v52, %v6222_v6  ;;  %v6309_v3 = vsub.f32 %v2334_v50, %v2430_v31 }
 0x28d   : > { %v7044_v44 = vand.u32 4294901760, %v6294_v20  ;;  %v2439_v43 = vand.u32 4294901760, %v2343_v16  ;;  %v2340_v35 = vsel %vm2311_vm0, %v2286_v27, 0  ;;  %v4782_v59 = vadd.f32 %v6222_v6, %v2148_v55 }
 0x28e   : > { %v2436_v30 = vand.u32 4294901760, %v2340_v35  ;;  %v2289_v61 = vmax.f32 %v4781_v63, 0.0  ;;  %v7045_v62 = vand.u32 4294901760, %v6309_v3  ;;  %v6322_v10 = vpack.c.bf16 %v2433_v47, %v2430_v31 }
 0x28f   : > { %v6316_v1 = vsub.f32 %v6294_v20, %v7044_v44  ;;  %v6318_v11 = vsub.f32 %v2343_v16, %v2439_v43  ;;  %v4359_v37 = vpop.f32.mrb[12].mxu0  ;;  %v2288_v33 = vmax.f32 %v4782_v59, 0.0 }
 0x290   : > { %v4783_v15 = vadd.f32 %v4359_v37, %v6222_v6  ;;  %v2160_v51 = vpop.f32.mrb[13].mxu0  ;;  %7328 = vst [vmem:[#allocation32_spill] sm:$0xff] %v6322_v10  ;;  %v6326_v18 = vsub.f32 %v2340_v35, %v2436_v30  ;;  %v6329_v29 = vsel %vm2311_vm0, %v2289_v61, 0  ;;  %v6334_v21 = vsub.f32 %v6309_v3, %v7045_v62 }
 0x291   : > { %v7042_v57 = vand.u32 4294901760, %v6318_v11  ;;  %v7053_v4 = vand.u32 4294901760, %v6329_v29  ;;  %v6338_v23 = vsel %vm2311_vm0, %v2288_v33, 0  ;;  %v4784_v16 = vadd.f32 %v6222_v6, %v2160_v51 }
 0x292   : > { %v2291_v47 = vmax.f32 %v4783_v15, 0.0  ;;  %v7043_v52 = vand.u32 4294901760, %v6326_v18  ;;  %v7054_v31 = vand.u32 4294901760, %v6338_v23 }
 0x293   : > { %v6343_v50 = vsub.f32 %v6318_v11, %v7042_v57  ;;  %v4362_v27 = vpop.f32.mrb[14].mxu0  ;;  %v6352_v63 = vsub.f32 %v6329_v29, %v7053_v4  ;;  %v2290_v32 = vmax.f32 %v4784_v16, 0.0 }
 0x294   : > { %v6355_v35 = vsel %vm2311_vm0, %v2291_v47, 0  ;;  %v4785_v59 = vadd.f32 %v4362_v27, %v6222_v6  ;;  %v2172_v61 = vpop.f32.mrb[15].mxu0  ;;  %v6362_v33 = vsub.f32 %v6326_v18, %v7043_v52  ;;  %v6367_v15 = vsub.f32 %v6338_v23, %v7054_v31 }
 0x295   : > { %v7051_v51 = vand.u32 4294901760, %v6355_v35  ;;  %v7047_v47 = vand.u32 4294901760, %v6352_v63  ;;  %v4786_v27 = vadd.f32 %v6222_v6, %v2172_v61  ;;  %v6379_v52 = vpack.c.bf16 %v2439_v43, %v2436_v30 }
 0x296   : > { %v2293_v56 = vmax.f32 %v4785_v59, 0.0  ;;  %v7049_v54 = vand.u32 4294901760, %v6367_v15  ;;  %v6387_v16 = vsel %vm2311_vm0, %v2290_v32, 0 }
 0x297   : > { %v6377_v22 = vsub.f32 %v6355_v35, %v7051_v51  ;;  %v4365_v57 = vpop.f32.mrb[16].mxu0  ;;  %7329 = vst [vmem:[#allocation15_spill] sm:$0xff] %v6379_v52  ;;  %v6384_v44 = vsub.f32 %v6352_v63, %v7047_v47  ;;  %v2292_v61 = vmax.f32 %v4786_v27, 0.0  ;;  %v2448_v30 = vand.u32 4294901760, %v6387_v16 }
 0x298   : > { %v6390_v59 = vsel %vm2311_vm0, %v2293_v56, 0  ;;  %v2184_v62 = vpop.f32.mrb[17].mxu0  ;;  %v6395_v12 = vsub.f32 %v6367_v15, %v7049_v54  ;;  %v4787_v56 = vadd.f32 %v4365_v57, %v6222_v6 }
 0x299   : > { %v7050_v43 = vand.u32 4294901760, %v6377_v22  ;;  %v2457_v47 = vand.u32 4294901760, %v6390_v59  ;;  %v2358_v32 = vsel %vm2311_vm0, %v2292_v61, 0  ;;  %v4788_v27 = vadd.f32 %v6222_v6, %v2184_v62 }
 0x29a   : > { %v6411_v14 = vsub.f32 %v6387_v16, %v2448_v30  ;;  %v2454_v55 = vand.u32 4294901760, %v2358_v32  ;;  %v2295_v61 = vmax.f32 %v4787_v56, 0.0 }
 0x29b   : > { %v6408_v54 = vsub.f32 %v6377_v22, %v7050_v43  ;;  %v6414_v36 = vsub.f32 %v6390_v59, %v2457_v47  ;;  %v4368_v2 = vpop.f32.mrb[18].mxu0  ;;  %v2294_v5 = vmax.f32 %v4788_v27, 0.0 }
 0x29c   : > { %v4789_v57 = vadd.f32 %v4368_v2, %v6222_v6  ;;  %v2196_v62 = vpop.f32.mrb[19].mxu0  ;;  %v7052_v28 = vand.u32 4294901760, %v6411_v14  ;;  %v6421_v16 = vsub.f32 %v2358_v32, %v2454_v55  ;;  %v2367_v59 = vsel %vm2311_vm0, %v2295_v61, 0 }
 0x29d   : > { %7330 = vst [vmem:[#allocation33_spill] sm:$0xff] %v6414_v36  ;;  %v7055_v43 = vand.u32 4294901760, %v6414_v36  ;;  %v4790_v53 = vadd.f32 %v6222_v6, %v2196_v62  ;;  %v2364_v49 = vsel %vm2311_vm0, %v2294_v5, 0  ;;  %v2463_v27 = vand.u32 4294901760, %v2367_v59 }
 0x29e   : > { %v2297_v24 = vmax.f32 %v4789_v57, 0.0  ;;  %v6428_v2 = vsub.f32 %v6411_v14, %v7052_v28  ;;  %v2460_v37 = vand.u32 4294901760, %v2364_v49  ;;  %v7064_v32 = vand.u32 4294901760, %v6421_v16 }
 0x29f   : > { %v6433_v56 = vsub.f32 %v6414_v36, %v7055_v43  ;;  %v4371_v62 = vpop.f32.mrb[20].mxu0  ;;  %v2296_v38 = vmax.f32 %v4790_v53, 0.0  ;;  %v6440_v4 = vsub.f32 %v2367_v59, %v2463_v27  ;;  %v7332_v59 = vand.u32 4294901760, %v6338_v23 }
 0x2a0   : > { %v2373_v61 = vsel %vm2311_vm0, %v2297_v24, 0  ;;  %v4791_v5 = vadd.f32 %v4371_v62, %v6222_v6  ;;  %v2208_v57 = vpop.f32.mrb[21].mxu0  ;;  %v6442_v31 = vsub.f32 %v2364_v49, %v2460_v37  ;;  %v6447_v43 = vsub.f32 %v6421_v16, %v7064_v32 }
 0x2a1   : > { %v2469_v46 = vand.u32 4294901760, %v2373_v61  ;;  %v2370_v24 = vsel %vm2311_vm0, %v2296_v38, 0  ;;  %v4792_v62 = vadd.f32 %v6222_v6, %v2208_v57  ;;  %v6451_v26 = vpack.c.bf16 %v2463_v27, %v2460_v37 }
 0x2a2   : > { %v2299_v53 = vmax.f32 %v4791_v5, 0.0  ;;  %v2466_v45 = vand.u32 4294901760, %v2370_v24  ;;  %v7333_v49 = vand.u32 4294901760, %v6329_v29  ;;  %v7075_v13 = vand.u32 4294901760, %v6442_v31 }
 0x2a3   : > { %7331 = vst [vmem:[#allocation34_spill] sm:$0xff] %v6451_v26  ;;  %v4374_v51 = vpop.f32.mrb[22].mxu0  ;;  %v6460_v32 = vsub.f32 %v2373_v61, %v2469_v46  ;;  %v2298_v27 = vmax.f32 %v4792_v62, 0.0  ;;  %4580 = vmatprep.subr.bf16.mxu1 %v6451_v26  ;;  %v7336_v61 = vand.u32 4294901760, %v6355_v35  ;;  %v7340_v26 = vand.u32 4294901760, %v6440_v4 }
 0x2a4   : > { %v6457_v28 = vpack.c.bf16 %v7333_v49, %v7332_v59  ;;  %v2379_v34 = vsel %vm2311_vm0, %v2299_v53, 0  ;;  %v4793_v38 = vadd.f32 %v4374_v51, %v6222_v6  ;;  %v2220_v5 = vpop.f32.mrb[23].mxu0  ;;  %v6464_v60 = vsub.f32 %v2370_v24, %v2466_v45  ;;  %4582 = vmatpush3.bf16.xpose.msra.mxu1 %v6236_v58 }
 0x2a5   : > { %v2475_v37 = vand.u32 4294901760, %v2379_v34  ;;  %v4794_v23 = vadd.f32 %v6222_v6, %v2220_v5  ;;  %v6469_v57 = vpack.c.bf16 %v2469_v46, %v2466_v45  ;;  %v6473_v59 = vpack.c.bf16 %v7336_v61, %v2448_v30 }
 0x2a6   : > { %7334 = vst [vmem:[#allocation19_spill] sm:$0xff] %v6457_v28  ;;  %v2301_v29 = vmax.f32 %v4793_v38, 0.0  ;;  %v6475_v53 = vpack.c.bf16 %v2457_v47, %v2454_v55  ;;  %v2376_v24 = vsel %vm2311_vm0, %v2298_v27, 0  ;;  %v2635_v30 = vsub.f32 %v6442_v31, %v7075_v13 }
 0x2a7   : > { %7335 = vst [vmem:[#allocation39_spill] sm:$0xff] %v6469_v57  ;;  %7337 = vst [vmem:[#allocation41_spill] sm:$0xff] %v6473_v59  ;;  %v6477_v51 = vsub.f32 %v2379_v34, %v2475_v37  ;;  %v2300_v62 = vmax.f32 %v4794_v23, 0.0  ;;  %v4377_v49 = vpop.f32.mrb[24].mxu0  ;;  %v2472_v5 = vand.u32 4294901760, %v2376_v24  ;;  %4584 = vmatprep.subr.bf16.mxu1 %v6469_v57 }
 0x2a8   : > { %7338 = vst [vmem:[#allocation42_spill] sm:$0xff] %v6475_v53  ;;  %v2385_v38 = vsel %vm2311_vm0, %v2301_v29, 0  ;;  %v4795_v45 = vadd.f32 %v4377_v49, %v6222_v6  ;;  %v2232_v46 = vpop.f32.mrb[25].mxu0  ;;  %v2636_v35 = vand.u32 4294901760, %v2635_v30 }
 0x2a9   : > { %v2481_v55 = vand.u32 4294901760, %v2385_v38  ;;  %v2382_v34 = vsel %vm2311_vm0, %v2300_v62, 0  ;;  %v4796_v47 = vadd.f32 %v6222_v6, %v2232_v46  ;;  %v6490_v27 = vsub.f32 %v2376_v24, %v2472_v5 }
 0x2aa   : > { %v2478_v23 = vand.u32 4294901760, %v2382_v34  ;;  %v2303_v29 = vmax.f32 %v4795_v45, 0.0  ;;  %v6492_v61 = vpack.c.bf16 %v2475_v37, %v2472_v5  ;;  %v2642_v62 = vsub.f32 %v6440_v4, %v7340_v26 }
 0x2ab   : > { %v6494_v57 = vsub.f32 %v2385_v38, %v2481_v55  ;;  %v2302_v49 = vmax.f32 %v4796_v47, 0.0  ;;  %v4380_v58 = vpop.f32.mrb[26].mxu0  ;;  %v7342_v26 = vand.u32 4294901760, %v6254_v7 }
 0x2ac   : > { %7339 = vst [vmem:[#allocation45_spill] sm:$0xff] %v6492_v61  ;;  %v6499_v46 = vsub.f32 %v2382_v34, %v2478_v23  ;;  %v2391_v53 = vsel %vm2311_vm0, %v2303_v29, 0  ;;  %v4797_v24 = vadd.f32 %v4380_v58, %v6222_v6  ;;  %v2244_v13 = vpop.f32.mrb[27].mxu0  ;;  %v6503_v59 = vpack.c.bf16 %v2481_v55, %v2478_v23  ;;  %4586 = vmatpush3.bf16.xpose.msra.mxu1 %v6273_v19 }
 0x2ad   : > { %v2487_v37 = vand.u32 4294901760, %v2391_v53  ;;  %v2388_v5 = vsel %vm2311_vm0, %v2302_v49, 0  ;;  %v4798_v38 = vadd.f32 %v6222_v6, %v2244_v13  ;;  %v2643_v45 = vand.u32 4294901760, %v2642_v62  ;;  %4588 = vmatprep.subr.bf16.mxu1 %v6492_v61 }
 0x2ae   : > { %7341 = vst [vmem:[#allocation50_spill] sm:$0xff] %v6503_v59  ;;  %v2484_v47 = vand.u32 4294901760, %v2388_v5  ;;  %v2305_v30 = vmax.f32 %v4797_v24, 0.0  ;;  %v7343_v34 = vand.u32 4294901760, %v6247_v39  ;;  %v7347_v61 = vand.u32 4294901760, %v6464_v60 }
 0x2af   : > { %v6515_v55 = vsub.f32 %v2391_v53, %v2487_v37  ;;  %v2304_v23 = vmax.f32 %v4798_v38, 0.0  ;;  %v4383_v49 = vpop.f32.mrb[28].mxu0  ;;  %v6518_v13 = vpack.c.bf16 %v2643_v45, %v2636_v35 }
 0x2b0   : > { %v6512_v29 = vpack.c.bf16 %v7343_v34, %v7342_v26  ;;  %v6521_v24 = vsub.f32 %v2388_v5, %v2484_v47  ;;  %v2397_v7 = vsel %vm2311_vm0, %v2305_v30, 0  ;;  %v4799_v39 = vadd.f32 %v4383_v49, %v6222_v6  ;;  %v2256_v26 = vpop.f32.mrb[29].mxu0 }
 0x2b1   : > { %7345 = vst [vmem:[#allocation52_spill] sm:$0xff] %v6518_v13  ;;  %v6525_v34 = vpack.c.bf16 %v2487_v37, %v2484_v47  ;;  %v2493_v58 = vand.u32 4294901760, %v2397_v7  ;;  %v2394_v53 = vsel %vm2311_vm0, %v2304_v23, 0  ;;  %v4800_v38 = vadd.f32 %v6222_v6, %v2256_v26 }
 0x2b2   : > { %7344 = vst [vmem:[#allocation51_spill] sm:$0xff] %v6512_v29  ;;  %v2649_v35 = vsub.f32 %v6464_v60, %v7347_v61  ;;  %v2490_v45 = vand.u32 4294901760, %v2394_v53  ;;  %v2307_v62 = vmax.f32 %v4799_v39, 0.0  ;;  %v7348_v5 = vand.u32 4294901760, %v6460_v32 }
 0x2b3   : > { %7346 = vst [vmem:[#allocation55_spill] sm:$0xff] %v6525_v34  ;;  %v7349_v49 = vand.u32 4294901760, %v6278_v25  ;;  %v7350_v37 = vand.u32 4294901760, %v6268_v42  ;;  %v6541_v19 = vsub.f32 %v2397_v7, %v2493_v58  ;;  %v2306_v23 = vmax.f32 %v4800_v38, 0.0  ;;  %v4386_v26 = vpop.f32.mrb[30].mxu0 }
 0x2b4   : > { %v2656_v30 = vsub.f32 %v6460_v32, %v7348_v5  ;;  %v2650_v29 = vand.u32 4294901760, %v2649_v35  ;;  %v7084_v13 = vand.u32 4294901760, %v6490_v27  ;;  %v6544_v61 = vsub.f32 %v2394_v53, %v2490_v45  ;;  %v2268_v5 = vpop.f32.mrb[31].mxu0  ;;  %4590 = vmatpush3.bf16.xpose.msra.mxu1 %v6297_v9 }
 0x2b5   : > { %v6539_v47 = vpack.c.bf16 %v7350_v37, %v7349_v49  ;;  %v2403_v39 = vsel %vm2311_vm0, %v2307_v62, 0  ;;  %v4801_v28 = vadd.f32 %v4386_v26, %v6222_v6  ;;  %v6548_v36 = vpack.c.bf16 %v2493_v58, %v2490_v45  ;;  %4592 = vmatprep.subr.bf16.mxu1 %v6503_v59 }
 0x2b6   : > { %v2499_v25 = vand.u32 4294901760, %v2403_v39  ;;  %v2400_v42 = vsel %vm2311_vm0, %v2306_v23, 0  ;;  %v4802_v7 = vadd.f32 %v6222_v6, %v2268_v5  ;;  %v2657_v49 = vand.u32 4294901760, %v2656_v30 }
 0x2b7   : > { %7351 = vst [vmem:[#allocation64_spill] sm:$0xff] %v6548_v36  ;;  %v2496_v38 = vand.u32 4294901760, %v2400_v42  ;;  %v2309_v37 = vmax.f32 %v4801_v28, 0.0  ;;  %v2663_v53 = vsub.f32 %v6490_v27, %v7084_v13  ;;  %v7085_v62 = vand.u32 4294901760, %v6477_v51 }
 0x2b8   : > { %v6557_v35 = vsub.f32 %v2403_v39, %v2499_v25  ;;  %v2308_v58 = vmax.f32 %v4802_v7, 0.0  ;;  %v6560_v45 = vpack.c.bf16 %v2657_v49, %v2650_v29  ;;  %v7352_v6 = vand.u32 4294901760, %v6302_v48 }
 0x2b9   : > { %v7353_v30 = vand.u32 4294901760, %v6292_v0  ;;  %v6568_v23 = vsub.f32 %v2400_v42, %v2496_v38  ;;  %v2409_v26 = vsel %vm2311_vm0, %v2309_v37, 0  ;;  %v6571_v5 = vpack.c.bf16 %v2499_v25, %v2496_v38 }
 0x2ba   : > { %v2664_v13 = vand.u32 4294901760, %v2663_v53  ;;  %v2505_v39 = vand.u32 4294901760, %v2409_v26  ;;  %v2406_v7 = vsel %vm2311_vm0, %v2308_v58, 0  ;;  %v2670_v29 = vsub.f32 %v6477_v51, %v7085_v62 }
 0x2bb   : > { %v6566_v28 = vpack.c.bf16 %v7353_v30, %v7352_v6  ;;  %v7086_v48 = vand.u32 4294901760, %v6499_v46  ;;  %v2502_v49 = vand.u32 4294901760, %v2406_v7  ;;  %v7355_v42 = vand.u32 4294901760, %v6334_v21 }
 0x2bc   : > { %v7356_v6 = vand.u32 4294901760, %v6316_v1  ;;  %v7090_v25 = vand.u32 4294901760, %v6521_v24  ;;  %v6586_v38 = vsub.f32 %v2409_v26, %v2505_v39  ;;  %v2671_v53 = vand.u32 4294901760, %v2670_v29  ;;  %4594 = vmatpush3.bf16.xpose.msra.mxu1 %v6322_v10 }
 0x2bd   : > { %7354 = vst [vmem:[#allocation65_spill] sm:$0xff] %v6566_v28  ;;  %v2677_v58 = vsub.f32 %v6499_v46, %v7086_v48  ;;  %v7089_v30 = vand.u32 4294901760, %v6515_v55  ;;  %v6592_v62 = vsub.f32 %v2406_v7, %v2502_v49  ;;  %v6594_v0 = vpack.c.bf16 %v2505_v39, %v2502_v49  ;;  %4596 = vmatprep.subr.bf16.mxu1 %v6525_v34 }
 0x2be   : > { %v6583_v37 = vpack.c.bf16 %v7356_v6, %v7355_v42  ;;  %v7358_v21 = vand.u32 4294901760, %v6494_v57  ;;  %v2691_v26 = vsub.f32 %v6521_v24, %v7090_v25  ;;  %v6602_v42 = vpack.c.bf16 %v2671_v53, %v2664_v13 }
 0x2bf   : > { %v2678_v29 = vand.u32 4294901760, %v2677_v58  ;;  %v2698_v6 = vsub.f32 %v6515_v55, %v7089_v30  ;;  %v7359_v7 = vand.u32 4294901760, %v6362_v33  ;;  %v7360_v39 = vand.u32 4294901760, %v6343_v50 }
 0x2c0   : > { %7357 = vst [vmem:[#allocation66_spill] sm:$0xff] %v6583_v37  ;;  %v2684_v1 = vsub.f32 %v6494_v57, %v7358_v21  ;;  %v2692_v48 = vand.u32 4294901760, %v2691_v26  ;;  %v2704_v59 = vand.u32 4294901760, %v6544_v61  ;;  %v2711_v13 = vand.u32 4294901760, %v6541_v19 }
 0x2c1   : > { %v6611_v49 = vpack.c.bf16 %v7360_v39, %v7359_v7  ;;  %v2699_v53 = vand.u32 4294901760, %v2698_v6  ;;  %v7362_v58 = vand.u32 4294901760, %v6395_v12  ;;  %v7363_v30 = vand.u32 4294901760, %v6384_v44 }
 0x2c2   : > { %v2685_v21 = vand.u32 4294901760, %v2684_v1  ;;  %v2718_v50 = vand.u32 4294901760, %v6568_v23  ;;  %v2725_v7 = vand.u32 4294901760, %v6557_v35  ;;  %v2705_v1 = vsub.f32 %v6544_v61, %v2704_v59 }
 0x2c3   : > { %7361 = vst [vmem:[#allocation17_spill] sm:$0xff] %v6611_v49  ;;  %v6621_v33 = vpack.c.bf16 %v7363_v30, %v7362_v58  ;;  %v2712_v26 = vsub.f32 %v6541_v19, %v2711_v13  ;;  %v7366_v25 = vand.u32 4294901760, %v6428_v2  ;;  %v7367_v6 = vand.u32 4294901760, %v6408_v54 }
 0x2c4   : > { %v6625_v39 = vpack.c.bf16 %v2685_v21, %v2678_v29  ;;  %v4627_v12 = vpack.c.bf16 %v2699_v53, %v2692_v48  ;;  %v2719_v44 = vsub.f32 %v6568_v23, %v2718_v50  ;;  %v2726_v30 = vsub.f32 %v6557_v35, %v2725_v7  ;;  %4598 = vmatpush3.bf16.xpose.msra.mxu1 %v6379_v52 }
 0x2c5   : > { %7364 = vst [vmem:[#allocation18_spill] sm:$0xff] %v6621_v33  ;;  %v6633_v34 = vpack.c.bf16 %v7367_v6, %v7366_v25  ;;  %v2732_v58 = vand.u32 4294901760, %v6592_v62  ;;  %v2706_v10 = vand.u32 4294901760, %v2705_v1  ;;  %v2713_v29 = vand.u32 4294901760, %v2712_v26  ;;  %4600 = vmatprep.subr.bf16.mxu1 %v6548_v36  ;;  %v7371_v36 = vld [vmem:[#allocation33_spill] sm:$0xff] }
 0x2c6   : > { %7365 = vst [vmem:[#allocation25_spill] sm:$0xff] %v6625_v39  ;;  %v2739_v21 = vand.u32 4294901760, %v6586_v38  ;;  %v7369_v9 = vand.u32 4294901760, %v6447_v43  ;;  %v7370_v33 = vand.u32 4294901760, %v6433_v56  ;;  %v2720_v49 = vand.u32 4294901760, %v2719_v44 }
 0x2c7   : > { %7368 = vst [vmem:[#allocation26_spill] sm:$0xff] %v6633_v34  ;;  %v2727_v54 = vand.u32 4294901760, %v2726_v30  ;;  %v2733_v25 = vsub.f32 %v6592_v62, %v2732_v58  ;;  %v4643_v48 = vpack.c.bf16 %v6440_v4, %v6442_v31  ;;  %v4631_v53 = vpack.c.bf16 %v2713_v29, %v2706_v10 }
 0x2c8   : > { %v4641_v2 = vpack.c.bf16 %v7370_v33, %v7369_v9  ;;  %v2740_v6 = vsub.f32 %v6586_v38, %v2739_v21  ;;  %v4647_v1 = vpack.c.bf16 %v6460_v32, %v6464_v60  ;;  %v4649_v26 = vpack.c.bf16 %v6249_v40, %v6256_v41 }
 0x2c9   : > { %v4635_v43 = vpack.c.bf16 %v2727_v54, %v2720_v49  ;;  %v2734_v34 = vand.u32 4294901760, %v2733_v25  ;;  %v4651_v9 = vpack.c.bf16 %v6477_v51, %v6490_v27  ;;  %v4653_v56 = vpack.c.bf16 %v6270_v17, %v6280_v8 }
 0x2ca   : > { %v2741_v33 = vand.u32 4294901760, %v2740_v6  ;;  %v4655_v10 = vpack.c.bf16 %v6494_v57, %v6499_v46  ;;  %v4657_v44 = vpack.c.bf16 %v6294_v20, %v6309_v3  ;;  %v4659_v30 = vpack.c.bf16 %v6515_v55, %v6521_v24 }
 0x2cb   : > { %v4661_v49 = vpack.c.bf16 %v6318_v11, %v6326_v18  ;;  %v4663_v29 = vpack.c.bf16 %v6541_v19, %v6544_v61  ;;  %v4665_v54 = vpack.c.bf16 %v6352_v63, %v6367_v15  ;;  %v4667_v25 = vpack.c.bf16 %v6557_v35, %v6568_v23 }
 0x2cc   : > { %v4639_v6 = vpack.c.bf16 %v2741_v33, %v2734_v34  ;;  %v4669_v40 = vpack.c.bf16 %v6377_v22, %v6411_v14  ;;  %v4671_v41 = vpack.c.bf16 %v6586_v38, %v6592_v62  ;;  %v4673_v52 = vpack.c.bf16 %v7371_v36, %v6421_v16 }
 0x2cd   : > { %v7372_v37 = vand.u32 4294901760, %v6442_v31  ;;  %v7373_v19 = vand.u32 4294901760, %v6440_v4  ;;  %v7374_v39 = vand.u32 4294901760, %v6464_v60  ;;  %v7375_v35 = vand.u32 4294901760, %v6460_v32 }
 0x2ce   : > { %v7376_v23 = vand.u32 4294901760, %v6490_v27  ;;  %v7377_v33 = vand.u32 4294901760, %v6477_v51  ;;  %v7378_v38 = vand.u32 4294901760, %v6280_v8  ;;  %v7379_v31 = vand.u32 4294901760, %v6270_v17 }
 0x2cf   : > { %v6681_v61 = vpack.c.bf16 %v7373_v19, %v7372_v37  ;;  %v6687_v34 = vpack.c.bf16 %v7375_v35, %v7374_v39  ;;  %v7380_v4 = vand.u32 4294901760, %v6499_v46  ;;  %v7381_v60 = vand.u32 4294901760, %v6494_v57 }
 0x2d0   : > { %v6693_v62 = vpack.c.bf16 %v7377_v33, %v7376_v23  ;;  %v6699_v28 = vpack.c.bf16 %v7379_v31, %v7378_v38  ;;  %v7382_v32 = vand.u32 4294901760, %v6309_v3  ;;  %v7383_v27 = vand.u32 4294901760, %v6294_v20  ;;  %v7404_v31 = vld [vmem:[#allocation17_spill] sm:$0xff] }
 0x2d1   : > { %v6705_v37 = vpack.c.bf16 %v7381_v60, %v7380_v4  ;;  %v7384_v51 = vand.u32 4294901760, %v6521_v24  ;;  %v7385_v8 = vand.u32 4294901760, %v6515_v55  ;;  %v7386_v17 = vand.u32 4294901760, %v6326_v18  ;;  %v7405_v4 = vld [vmem:[#allocation18_spill] sm:$0xff] }
 0x2d2   : > { %v6711_v39 = vpack.c.bf16 %v7383_v27, %v7382_v32  ;;  %v7387_v46 = vand.u32 4294901760, %v6318_v11  ;;  %v6725_v57 = vpack.c.bf16 %v2711_v13, %v2704_v59  ;;  %v7388_v3 = vand.u32 4294901760, %v6367_v15  ;;  %v7394_v15 = vld [vmem:[#allocation19_spill] sm:$0xff]  ;;  %v7406_v60 = vld [vmem:[#allocation26_spill] sm:$0xff]  ;;  %v7410_v32 = vld [vmem:[#allocation16_spill] sm:$0xff] }
 0x2d3   : > { %v6717_v19 = vpack.c.bf16 %v7385_v8, %v7384_v51  ;;  %v7389_v20 = vand.u32 4294901760, %v6352_v63  ;;  %v6733_v33 = vpack.c.bf16 %v2725_v7, %v2718_v50  ;;  %v7390_v55 = vand.u32 4294901760, %v6411_v14  ;;  %4602 = vmatpush3.bf16.xpose.msra.mxu1 %v7394_v15  ;;  %v7395_v63 = vld [vmem:[#allocation41_spill] sm:$0xff]  ;;  %v7396_v14 = vld [vmem:[#allocation42_spill] sm:$0xff]  ;;  %v7398_v50 = vld [vmem:[#allocation11_spill] sm:$0xff] }
 0x2d4   : > { %v6723_v35 = vpack.c.bf16 %v7387_v46, %v7386_v17  ;;  %v7391_v24 = vand.u32 4294901760, %v6377_v22  ;;  %v6741_v18 = vpack.c.bf16 %v2739_v21, %v2732_v58  ;;  %v7392_v11 = vand.u32 4294901760, %v6421_v16  ;;  %4604 = vmatprep.subr.bf16.mxu1 %v6571_v5  ;;  %v7397_v22 = vld [vmem:[#allocation52_spill] sm:$0xff]  ;;  %v7399_v7 = vld [vmem:[#allocation51_spill] sm:$0xff]  ;;  %v7400_v16 = vld [vmem:[#allocation13_spill] sm:$0xff] }
 0x2d5   : > { %v6731_v23 = vpack.c.bf16 %v7389_v20, %v7388_v3  ;;  %v7393_v59 = vand.u32 4294901760, %v7371_v36  ;;  %v7401_v36 = vld [vmem:[#allocation65_spill] sm:$0xff]  ;;  %v7403_v21 = vld [vmem:[#allocation66_spill] sm:$0xff] }
 0x2d6   : > { %v6739_v38 = vpack.c.bf16 %v7391_v24, %v7390_v55  ;;  %v7402_v58 = vld [vmem:[#allocation25_spill] sm:$0xff] }
 0x2d7   : > { %v6747_v13 = vpack.c.bf16 %v7393_v59, %v7392_v11 }
 0x2db   : > { %4606 = vmatpush3.bf16.xpose.msra.mxu1 %v7395_v63 }
 0x2dc   : > { %4608 = vmatprep.subr.bf16.mxu1 %v6594_v0 }
 0x2e3   : > { %4610 = vmatpush3.bf16.xpose.msra.mxu1 %v7396_v14 }
 0x2e4   : > { %4612 = vmatprep.subr.bf16.mxu1 %v7397_v22 }
 0x2ea   : > { %3736 = vmatmul.mubr.f32.vlgmr.msra.gmra.mrb[0].mxu1 %v7398_v50 }
 0x2eb   : > { %4614 = vmatpush3.bf16.xpose.msra.mxu1 %v7399_v7  ;;  %3769 = vmatprep.mubr.f32.mxu1 %v7400_v16 }
 0x2ec   : > { %4616 = vmatprep.subr.bf16.mxu1 %v6560_v45  ;;  %v7408_v45 = vld [vmem:[#allocation23_spill] sm:$0xff] }
 0x2f3   : > { %4618 = vmatpush3.bf16.xpose.msra.mxu1 %v6539_v47  ;;  %v7407_v47 = vld [vmem:[#allocation21_spill] sm:$0xff] }
 0x2f4   : > { %4620 = vmatprep.subr.bf16.mxu1 %v6602_v42  ;;  %v7409_v42 = vpack.c.bf16 %v7407_v47, %v7408_v45 }
 0x2fb   : > { %4622 = vmatpush3.bf16.xpose.msra.mxu1 %v7401_v36 }
 0x2fc   : > { %4624 = vmatprep.subr.bf16.mxu1 %v7402_v58 }
 0x303   : > { %4626 = vmatpush3.bf16.xpose.msra.mxu1 %v7403_v21 }
 0x304   : > { %4628 = vmatprep.subr.bf16.mxu1 %v4627_v12  ;;  %v7411_v12 = vld [vmem:[#allocation34_spill] sm:$0xff] }
 0x30b   : > { %4630 = vmatpush3.bf16.xpose.msra.mxu1 %v7404_v31 }
 0x30c   : > { %4632 = vmatprep.subr.bf16.mxu1 %v4631_v53  ;;  %v7414_v53 = vld [vmem:[#allocation39_spill] sm:$0xff] }
 0x313   : > { %4634 = vmatpush3.bf16.xpose.msra.mxu1 %v7405_v4 }
 0x314   : > { %4636 = vmatprep.subr.bf16.mxu1 %v4635_v43  ;;  %v7417_v43 = vld [vmem:[#allocation31_spill] sm:$0xff] }
 0x31b   : > { %4638 = vmatpush3.bf16.xpose.msra.mxu1 %v7406_v60 }
 0x31c   : > { %4640 = vmatprep.subr.bf16.mxu1 %v4639_v6  ;;  %v7427_v6 = vld [vmem:[#allocation24_spill] sm:$0xff] }
 0x323   : > { %4642 = vmatpush3.bf16.xpose.msra.mxu1 %v4641_v2  ;;  %v7412_v2 = vld [vmem:[#allocation12_spill] sm:$0xff] }
 0x324   : > { %4644 = vmatprep.subr.bf16.mxu1 %v4643_v48  ;;  %v7413_v48 = vld [vmem:[#allocation20_spill] sm:$0xff] }
 0x32a   : > { %3770 = vmatmul.mubr.f32.vlgmr.msra.gmra.mrb[0].mxu1 %v7400_v16 }
 0x32b   : > { %4646 = vmatpush3.bf16.xpose.msra.mxu1 %v7409_v42  ;;  %3803 = vmatprep.mubr.f32.mxu1 %v7410_v32 }
 0x32c   : > { %4648 = vmatprep.subr.bf16.mxu1 %v4647_v1  ;;  %v7415_v1 = vld [vmem:[#allocation14_spill] sm:$0xff] }
 0x333   : > { %4650 = vmatpush3.bf16.xpose.msra.mxu1 %v4649_v26  ;;  %v7416_v26 = vld [vmem:[#allocation45_spill] sm:$0xff] }
 0x334   : > { %4652 = vmatprep.subr.bf16.mxu1 %v4651_v9  ;;  %v7418_v9 = vld [vmem:[#allocation50_spill] sm:$0xff] }
 0x33b   : > { %4654 = vmatpush3.bf16.xpose.msra.mxu1 %v4653_v56  ;;  %v7422_v56 = vld [vmem:[#allocation64_spill] sm:$0xff] }
 0x33c   : > { %4656 = vmatprep.subr.bf16.mxu1 %v4655_v10  ;;  %v7423_v10 = vand.u32 4294901760, %v7408_v45 }
 0x343   : > { %4658 = vmatpush3.bf16.xpose.msra.mxu1 %v4657_v44  ;;  %v7424_v44 = vand.u32 4294901760, %v7407_v47 }
 0x344   : > { %4660 = vmatprep.subr.bf16.mxu1 %v4659_v30 }
 0x345   : > { %v4709_v30 = vpack.c.bf16 %v7424_v44, %v7423_v10 }
 0x34b   : > { %4662 = vmatpush3.bf16.xpose.msra.mxu1 %v4661_v49  ;;  %v3266_v49 = vld [vmem:[#allocation4] sm:$0x1] }
 0x34c   : > { %4664 = vmatprep.subr.bf16.mxu1 %v4663_v29  ;;  %v5133_v29 = vmov 0  }
 0x34d   : > { %5023 = vset.pattern.permute.xlu0 %v5133_v29 }
 0x34e   : > { %3269 = vperm.xlu0 %5023, %v3266_v49  }
 0x353   : > { %4666 = vmatpush3.bf16.xpose.msra.mxu1 %v4665_v54  ;;  %v7425_v54 = vld [vmem:[#allocation30_spill] sm:$0xff] }
 0x354   : > { %4668 = vmatprep.subr.bf16.mxu1 %v4667_v25  ;;  %v7426_v25 = vand.u32 4294901760, %v7425_v54 }
 0x35b   : > { %4670 = vmatpush3.bf16.xpose.msra.mxu1 %v4669_v40  ;;  %v7419_v40 = vld [vmem:[#allocation32_spill] sm:$0xff] }
 0x35c   : > { %4672 = vmatprep.subr.bf16.mxu1 %v4671_v41  ;;  %v7420_v41 = vld [vmem:[#allocation55_spill] sm:$0xff] }
 0x363   : > { %4674 = vmatpush3.bf16.xpose.msra.mxu1 %v4673_v52  ;;  %v7421_v52 = vld [vmem:[#allocation15_spill] sm:$0xff] }
 0x364   : > { %4676 = vmatprep.subr.bf16.mxu1 %v7411_v12 }
 0x36a   : > { %3804 = vmatmul.mubr.f32.vlgmr.msra.gmra.mrb[0].mxu1 %v7410_v32 }
 0x36b   : > { %4678 = vmatpush3.bf16.xpose.msra.mxu1 %v7412_v2  ;;  %3837 = vmatprep.mubr.f32.mxu1 %v7413_v48 }
 0x36c   : > { %4680 = vmatprep.subr.bf16.mxu1 %v7414_v53 }
 0x373   : > { %4682 = vmatpush3.bf16.xpose.msra.mxu1 %v7415_v1 }
 0x374   : > { %4684 = vmatprep.subr.bf16.mxu1 %v7416_v26 }
 0x37b   : > { %4686 = vmatpush3.bf16.xpose.msra.mxu1 %v7417_v43 }
 0x37c   : > { %4688 = vmatprep.subr.bf16.mxu1 %v7418_v9 }
 0x383   : > { %4690 = vmatpush3.bf16.xpose.msra.mxu1 %v7419_v40 }
 0x384   : > { %4692 = vmatprep.subr.bf16.mxu1 %v7420_v41 }
 0x38b   : > { %4694 = vmatpush3.bf16.xpose.msra.mxu1 %v7421_v52 }
 0x38c   : > { %4696 = vmatprep.subr.bf16.mxu1 %v7422_v56 }
 0x393   : > { %4698 = vmatpush3.bf16.xpose.msra.mxu1 %v7394_v15 }
 0x394   : > { %4700 = vmatprep.subr.bf16.mxu1 %v6571_v5 }
 0x39b   : > { %4702 = vmatpush3.bf16.xpose.msra.mxu1 %v7395_v63 }
 0x39c   : > { %4704 = vmatprep.subr.bf16.mxu1 %v6594_v0 }
 0x3a3   : > { %4706 = vmatpush3.bf16.xpose.msra.mxu1 %v7396_v14 }
 0x3a4   : > { %4708 = vmatprep.subr.bf16.mxu1 %v6681_v61  ;;  %v7428_v61 = vand.u32 4294901760, %v7427_v6 }
 0x3a6   : > { %v4713_v27 = vpack.c.bf16 %v7428_v61, %v7426_v25 }
 0x3aa   : > { %3838 = vmatmul.mubr.f32.vlgmr.msra.gmra.mrb[0].mxu1 %v7413_v48 }
 0x3ab   : > { %4710 = vmatpush3.bf16.xpose.msra.mxu1 %v4709_v30  ;;  %3871 = vmatprep.mubr.f32.mxu1 %v7400_v16 }
 0x3ac   : > { %4712 = vmatprep.subr.bf16.mxu1 %v6687_v34 }
 0x3b3   : > { %4714 = vmatpush3.bf16.xpose.msra.mxu1 %v4713_v27 }
 0x3b4   : > { %4716 = vmatprep.subr.bf16.mxu1 %v6693_v62 }
 0x3bb   : > { %4718 = vmatpush3.bf16.xpose.msra.mxu1 %v6699_v28  ;;  %v3272_v28 = vlaneseq }
 0x3bc   : > { %4720 = vmatprep.subr.bf16.mxu1 %v6705_v37 }
 0x3bd   : > { %v3273_v34 = vshrl.u32 %v3272_v28, 7  ;;  %vm3310_vm1 = vcmp.lt.s32.totalorder %v3272_v28, 256 }
 0x3bf   : > { %v3274_v62 = vsub.s32 0, %v3273_v34 }
 0x3c3   : > { %4722 = vmatpush3.bf16.xpose.msra.mxu1 %v6711_v39 }
 0x3c4   : > { %4724 = vmatprep.subr.bf16.mxu1 %v6717_v19 }
 0x3cb   : > { %4726 = vmatpush3.bf16.xpose.msra.mxu1 %v6723_v35 }
 0x3cc   : > { %4728 = vmatprep.subr.bf16.mxu1 %v6725_v57 }
 0x3cd   : > { %v3270_v37 = vpop.permute.xlu0 %3269 }
 0x3ce   : > { %v3275_v39 = vrot.slane %v3270_v37, %v3274_v62 }
 0x3d3   : > { %4730 = vmatpush3.bf16.xpose.msra.mxu1 %v6731_v23 }
 0x3d4   : > { %4732 = vmatprep.subr.bf16.mxu1 %v6733_v33  ;;  %v5134_v33 = vmov 1966171168  }
 0x3d5   : > { %v3294_v55 = vunpack.c.l.s4 %v5134_v33 }
 0x3d7   : > { %v3295_v24 = vunpack.c.0.s8 %v3294_v55 }
 0x3db   : > { %4734 = vmatpush3.bf16.xpose.msra.mxu1 %v6739_v38 }
 0x3dc   : > { %4736 = vmatprep.subr.bf16.mxu1 %v6741_v18  ;;  %v3298_v18 = vsub.s32 %v3295_v24, %v3273_v34 }
 0x3e3   : > { %4738 = vmatpush3.bf16.xpose.msra.mxu1 %v6747_v13 }
 0x3e4   : > { %4740 = vmatprep.subr.bf16.mxu1 %v7411_v12 }
 0x3ea   : > { %3872 = vmatmul.mubr.f32.vlgmr.msra.gmra.mrb[0].mxu1 %v7400_v16 }
 0x3eb   : > { %4742 = vmatpush3.bf16.xpose.msra.mxu1 %v7412_v2  ;;  %3905 = vmatprep.mubr.f32.mxu1 %v7400_v16 }
 0x3ec   : > { %4744 = vmatprep.subr.bf16.mxu1 %v7414_v53 }
 0x3f3   : > { %4746 = vmatpush3.bf16.xpose.msra.mxu1 %v7415_v1 }
 0x3f4   : > { %4748 = vmatprep.subr.bf16.mxu1 %v7416_v26 }
 0x3fb   : > { %4750 = vmatpush3.bf16.xpose.msra.mxu1 %v7417_v43 }
 0x3fc   : > { %4752 = vmatprep.subr.bf16.mxu1 %v7418_v9 }
 0x403   : > { %4754 = vmatpush3.bf16.xpose.msra.mxu1 %v7419_v40 }
 0x404   : > { %4756 = vmatprep.subr.bf16.mxu1 %v7420_v41 }
 0x40b   : > { %4758 = vmatpush3.bf16.xpose.msra.mxu1 %v7421_v52 }
 0x40c   : > { %4760 = vmatprep.subr.bf16.mxu1 %v7422_v56 }
 0x413   : > { %4762 = vmatpush3.bf16.xpose.msra.mxu1 %v7394_v15 }
 0x414   : > { %4764 = vmatprep.subr.bf16.mxu1 %v6571_v5 }
 0x41b   : > { %4766 = vmatpush3.bf16.xpose.msra.mxu1 %v7395_v63 }
 0x41c   : > { %4768 = vmatprep.subr.bf16.mxu1 %v6594_v0 }
 0x423   : > { %4770 = vmatpush3.bf16.xpose.msra.mxu1 %v7396_v14 }
 0x42a   : > { %3906 = vmatmul.mubr.f32.vlgmr.msra.gmra.mrb[0].mxu1 %v7400_v16 }
 0x4fd   : > { %v3261_v51 = vpop.f32.mrb[0].mxu1 }
 0x4fe   : > { %v3276_v8 = vadd.f32 %v3275_v39, %v3261_v51  ;;  %v3263_v19 = vpop.f32.mrb[1].mxu1 }
 0x4ff   : > { %v3277_v17 = vadd.f32 %v3275_v39, %v3263_v19 }
 0x500   : > { %v3278_v46 = vsub.f32 0.0, %v3276_v8 }
 0x501   : > { %v3279_v5 = vsub.f32 0.0, %v3277_v17 }
 0x502   : > { %v3280_v35 = vmul.f32 1.442695, %v3278_v46 }
 0x503   : > { %v3282_v57 = vmul.f32 1.442695, %v3279_v5 }
 0x504   : > { %5024 = vpow2.f32 %v3280_v35 }
 0x505   : > { %5026 = vpow2.f32 %v3282_v57 }
 0x50e   : > { %v5025_v0 = vpop.eup %5024 }
 0x50f   : > { %v5027_v3 = vpop.eup %5026  ;;  %v3284_v20 = vadd.f32 1.0, %v5025_v0 }
 0x510   : > { %v3285_v23 = vadd.f32 1.0, %v5027_v3 }
 0x511   : > { %5028 = vrcp.f32 %v3284_v20 }
 0x512   : > { %5030 = vrcp.f32 %v3285_v23 }
 0x51b   : > { %v5029_v38 = vpop.eup %5028 }
 0x51c   : > { %v5031_v11 = vpop.eup %5030 }
 0x51d   : > { %v3292_v59 = vcombine.low %v5029_v38, %v5031_v11 }
 0x51f   : > { %v3299_v13 = vrot.slane %v3292_v59, %v3298_v18 }
 0x521   : > { %v3306_v15 = vrot.slane %v3299_v13, %v3298_v18 }
 0x523   : > { %3312 = vst.msk [vmem:[%s246_s12] sm:$0x3] %vm3310_vm1, %v3306_v15 }
 0x524   : > { %5075 = shalt.err (!%p5072_p2)
}
 0x525   : > { %s5076_s21 = scalar_lea.hbm %s6838_s15, 32  ;;  %s5080_s19 = scalar_lea.hbm %s6888_s6, 64 }
 0x526   : > { %p5077_p4 = scmp.ne.s32.totalorder %s6838_s15, %s5076_s21  ;;  %p5081_p9 = scmp.lt.u32.totalorder %s6838_s15, %s6888_s6 }
 0x527   : > { %p5082_p1 = scmp.lt.u32.totalorder %s5080_s19, %s5076_s21  ;;  %p5084_p6 = scmp.lt.u32.totalorder %s5076_s21, %s6838_s15 }
 0x528   : > { %p5078_p5 = pnand %p5077_p4, %p7429_p11 }
 0x529   : > { %p5083_p3 = por %p5082_p1, %p5081_p9 }
 0x52a   : > { %p5079_p7 = pneg %p5078_p5 }
 0x52b   : > { %p5085_p12 = por %p5084_p6, %p5083_p3 }
 0x52d   : > { %p5086_p13 = pnand %p5085_p12, %p5079_p7 }
 0x52f   : > { %5089 = shalt.err (!%p5086_p13)
}
 0x530   : > { %4975 = dma.vmem_to_hbm [thread:$0]  (%p7429_p11), %s6840_s8, 32, %s6838_s15, %s3314_s17  }
 0x531 PF: > { %s3340_s7 = sand.u32 1, %s5116_s22   ;;  %p7430_p8 = scmp.ne.s32.totalorder %s7106_s10, 0 }
 0x532   : > { %p7431_p10 = scmp.ge.s32.totalorder %s5128_s25, 2  ;;  %s3341_s11 = scalar_lea.sflag [#allocation7], %s3340_s7 }
 0x534   : > { %p4982_p0 = pnand %p7431_p10, %p7430_p8 }
 0x536   : > { %5111 = dma.done.wait (!%p4982_p0), %s3341_s11, 32  }
 0x537   : > { %5113 = vsyncadd (!%p4982_p0), %s3341_s11, 4294967264  ;;  %p22_p2 = scmp.ge.s32.totalorder %s5199_s27, 4   ;;  %s7432_s22 = smov %s5120_s23 }
 0x538   : > { %s7433_s23 = smov %s5124_s24  ;;  %s7434_s24 = smov %s5211_s30 }
 0x539   : > { %s7435_s25 = smov %s5199_s27  ;;  %24 = sbr.rel (!%p22_p2) target bundleno = 8 (0x8), region = 85 }
 0x540   :  { %3346 = vsyncpa [#allocation6], 1 }
 0x541   :  { %3348 = vsyncpa [#allocation6 + $0x1], 1 }
 0x542   :  { %3349 = vsyncpa [#allocation7], 1 }
 0x543   :  { %3351 = vsyncpa [#allocation7 + $0x1], 1 }

</bundles_post_ra>
